<compile_context>
chip_gen: v7x
topology: tpu7x:2x2x1
jax: 0.10.0
libtpu: 0.0.40
codegen_flags: <defaults>
</compile_context>

<pallas_src>
import math
from functools import partial

import jax
import jax.numpy as jnp
from jax.experimental import pallas as pl
from jax.experimental.pallas import tpu as pltpu

NEG_INF = -1e9   # large negative additive mask value (softmax-equivalent to -inf)
LN_EPS = 1e-5
BF16 = jnp.bfloat16


# ----------------------------------------------------------------------------
# In-kernel helpers
# ----------------------------------------------------------------------------
def _layernorm(x, g, b):
    # x: [S, D] f32, g/b: [1, D] f32 ; biased variance, matches nn.LayerNorm
    mu = jnp.mean(x, axis=-1, keepdims=True)
    var = jnp.mean(jnp.square(x - mu), axis=-1, keepdims=True)
    return (x - mu) * jax.lax.rsqrt(var + LN_EPS) * g + b


# ----------------------------------------------------------------------------
# Pallas kernels
# ----------------------------------------------------------------------------
def _mha_block_kernel(xq_ref, xkv_ref, wq_ref, bq_ref, wkv_ref, bkv_ref,
                      wo_ref, bo_ref, bias_ref, g_ref, b_ref, o_ref,
                      *, n_heads, head_dim, scale):
    """Fused: Q proj + KV proj + per-head attention + out proj + residual + LN.

    One grid step == one batch element.
    """
    xq = xq_ref[0]                      # [Sq, D] f32
    xkv = xkv_ref[0]                    # [Sk, D] f32
    d_model = n_heads * head_dim

    # projections (bf16 inputs on the MXU, f32 accumulation)
    q = jnp.dot(xq.astype(BF16), wq_ref[...],
                preferred_element_type=jnp.float32) + bq_ref[...]        # [Sq, D]
    kv = jnp.dot(xkv.astype(BF16), wkv_ref[...],
                 preferred_element_type=jnp.float32) + bkv_ref[...]      # [Sk, 2D]

    bias = bias_ref[0, 0]               # [Sq, Sk] additive mask (shared by heads)

    # per-head attention; output projection folded in per head (no concat)
    acc = jnp.zeros(q.shape, jnp.float32)                                # [Sq, D]
    for h in range(n_heads):
        lo, hi = h * head_dim, (h + 1) * head_dim
        qh = q[:, lo:hi]                                                  # [Sq, Dh]
        kh = kv[:, lo:hi]                                                 # [Sk, Dh]
        vh = kv[:, d_model + lo:d_model + hi]                             # [Sk, Dh]

        s = jnp.dot(qh, kh.T, preferred_element_type=jnp.float32) * scale + bias
        m = jnp.max(s, axis=-1, keepdims=True)
        p = jnp.exp(s - m)
        p = p * pl.reciprocal(jnp.sum(p, axis=-1, keepdims=True), approx=True)

        oh = jnp.dot(p, vh, preferred_element_type=jnp.float32)           # [Sq, Dh]
        acc = acc + jnp.dot(oh.astype(BF16), wo_ref[lo:hi, :],
                            preferred_element_type=jnp.float32)           # [Sq, D]

    attn = acc + bo_ref[...]
    o_ref[0] = _layernorm(attn + xq, g_ref[...], b_ref[...])


def _ffn_block_kernel(x_ref, w1_ref, b1_ref, w2_ref, b2_ref, g_ref, b_ref, o_ref):
    """Fused: linear1 + ReLU + linear2 + residual + post-LayerNorm."""
    x = x_ref[0]                                                          # [S, D]
    h = jnp.dot(x.astype(BF16), w1_ref[...],
                preferred_element_type=jnp.float32) + b1_ref[...]         # [S, F]
    h = jnp.maximum(h, 0.0)
    y = jnp.dot(h.astype(BF16), w2_ref[...],
                preferred_element_type=jnp.float32) + b2_ref[...]         # [S, D]
    o_ref[0] = _layernorm(y + x, g_ref[...], b_ref[...])


def _ln_kernel(x_ref, g_ref, b_ref, o_ref):
    """Pure LayerNorm (encoder/decoder final norm) -- no dummy zero residual."""
    o_ref[0] = _layernorm(x_ref[0], g_ref[...], b_ref[...])


def _generator_kernel(x_ref, w_ref, b_ref, o_ref):
    """Final vocab projection; output N is pre-padded to a multiple of 128."""
    o_ref[0] = jnp.dot(x_ref[0].astype(BF16), w_ref[...],
                       preferred_element_type=jnp.float32) + b_ref[...]


# ----------------------------------------------------------------------------
# Pallas wrappers (grid over batch, "parallel" for megacore / v7x dual-TC)
# ----------------------------------------------------------------------------
_PARALLEL_B = pltpu.CompilerParams(dimension_semantics=("parallel",))


def mha_block(xq, xkv, bias, ap, ln_g, ln_b, n_heads):
    B, Sq, D = xq.shape
    Sk = xkv.shape[1]
    Dh = D // n_heads
    scale = 1.0 / math.sqrt(Dh)
    kernel = partial(_mha_block_kernel, n_heads=n_heads, head_dim=Dh, scale=scale)
    return pl.pallas_call(
        kernel,
        out_shape=jax.ShapeDtypeStruct((B, Sq, D), jnp.float32),
        grid=(B,),
        in_specs=[
            pl.BlockSpec((1, Sq, D), lambda b: (b, 0, 0)),           # x_q
            pl.BlockSpec((1, Sk, D), lambda b: (b, 0, 0)),           # x_kv
            pl.BlockSpec((D, D), lambda b: (0, 0)),                  # wq (bf16)
            pl.BlockSpec((1, D), lambda b: (0, 0)),                  # bq
            pl.BlockSpec((D, 2 * D), lambda b: (0, 0)),              # wkv (bf16)
            pl.BlockSpec((1, 2 * D), lambda b: (0, 0)),              # bkv
            pl.BlockSpec((D, D), lambda b: (0, 0)),                  # wo (bf16)
            pl.BlockSpec((1, D), lambda b: (0, 0)),                  # bo
            pl.BlockSpec((1, 1, Sq, Sk), lambda b: (b, 0, 0, 0)),    # bias (B,1,Sq,Sk)
            pl.BlockSpec((1, D), lambda b: (0, 0)),                  # ln gamma
            pl.BlockSpec((1, D), lambda b: (0, 0)),                  # ln beta
        ],
        out_specs=pl.BlockSpec((1, Sq, D), lambda b: (b, 0, 0)),
        compiler_params=_PARALLEL_B,
    )(xq, xkv, ap["wq"], ap["bq"], ap["wkv"], ap["bkv"], ap["wo"], ap["bo"],
      bias, ln_g, ln_b)


def ffn_block(x, w1, b1, w2, b2, ln_g, ln_b):
    B, S, D = x.shape
    F = w1.shape[1]
    return pl.pallas_call(
        _ffn_block_kernel,
        out_shape=jax.ShapeDtypeStruct((B, S, D), jnp.float32),
        grid=(B,),
        in_specs=[
            pl.BlockSpec((1, S, D), lambda b: (b, 0, 0)),
            pl.BlockSpec((D, F), lambda b: (0, 0)),
            pl.BlockSpec((1, F), lambda b: (0, 0)),
            pl.BlockSpec((F, D), lambda b: (0, 0)),
            pl.BlockSpec((1, D), lambda b: (0, 0)),
            pl.BlockSpec((1, D), lambda b: (0, 0)),
            pl.BlockSpec((1, D), lambda b: (0, 0)),
        ],
        out_specs=pl.BlockSpec((1, S, D), lambda b: (b, 0, 0)),
        compiler_params=_PARALLEL_B,
    )(x, w1, b1, w2, b2, ln_g, ln_b)


def layer_norm(x, g, b):
    B, S, D = x.shape
    return pl.pallas_call(
        _ln_kernel,
        out_shape=jax.ShapeDtypeStruct((B, S, D), jnp.float32),
        grid=(B,),
        in_specs=[
            pl.BlockSpec((1, S, D), lambda b: (b, 0, 0)),
            pl.BlockSpec((1, D), lambda b: (0, 0)),
            pl.BlockSpec((1, D), lambda b: (0, 0)),
        ],
        out_specs=pl.BlockSpec((1, S, D), lambda b: (b, 0, 0)),
        compiler_params=_PARALLEL_B,
    )(x, g, b)


def generator(x, w, b):
    B, S, D = x.shape
    Vp = w.shape[1]                       # already padded to a multiple of 128
    return pl.pallas_call(
        _generator_kernel,
        out_shape=jax.ShapeDtypeStruct((B, S, Vp), jnp.float32),
        grid=(B,),
        in_specs=[
            pl.BlockSpec((1, S, D), lambda b: (b, 0, 0)),
            pl.BlockSpec((D, Vp), lambda b: (0, 0)),
            pl.BlockSpec((1, Vp), lambda b: (0, 0)),
        ],
        out_specs=pl.BlockSpec((1, S, Vp), lambda b: (b, 0, 0)),
        compiler_params=_PARALLEL_B,
    )(x, w, b)


# ----------------------------------------------------------------------------
# Model glue
# ----------------------------------------------------------------------------
def make_bias(attn_mask, key_pad, B, Sq, Sk):
    # Shared across heads: keep a (B, 1, Sq, Sk) additive bias (never broadcast to H).
    bias = jnp.zeros((B, 1, Sq, Sk), jnp.float32)
    if attn_mask is not None:
        bias = bias + attn_mask[None, None, :, :]
    if key_pad is not None:
        bias = bias + jnp.where(key_pad, NEG_INF, 0.0)[:, None, None, :]
    return bias


def seq2seq_forward(params, cfg, src, tgt, src_mask, tgt_mask,
                    src_padding_mask, tgt_padding_mask, memory_key_padding_mask):
    D = cfg["d_model"]
    H = cfg["n_heads"]
    V = cfg["tgt_vocab"]
    B, Ns = src.shape
    Nt = tgt.shape[1]

    # token embedding * sqrt(d_model) + sinusoidal PE (dropout = identity)
    # TODO(synk): embedding gather + PE add kept in plain JAX (no clean tiny-Pallas gather).
    src_emb = jnp.take(params["src_emb"], src, axis=0) * math.sqrt(D) + params["pe"][:Ns]
    tgt_emb = jnp.take(params["tgt_emb"], tgt, axis=0) * math.sqrt(D) + params["pe"][:Nt]

    src_bias = make_bias(src_mask, src_padding_mask, B, Ns, Ns)
    tgt_bias = make_bias(tgt_mask, tgt_padding_mask, B, Nt, Nt)
    mem_bias = make_bias(None, memory_key_padding_mask, B, Nt, Ns)

    # encoder
    x = src_emb
    for lp in params["enc_layers"]:
        x = mha_block(x, x, src_bias, lp["self_attn"], lp["ln1_g"], lp["ln1_b"], H)
        x = ffn_block(x, lp["w1"], lp["b1"], lp["w2"], lp["b2"], lp["ln2_g"], lp["ln2_b"])
    memory = layer_norm(x, params["enc_norm_g"], params["enc_norm_b"])

    # decoder
    y = tgt_emb
    for lp in params["dec_layers"]:
        y = mha_block(y, y, tgt_bias, lp["self_attn"], lp["ln1_g"], lp["ln1_b"], H)
        y = mha_block(y, memory, mem_bias, lp["cross_attn"], lp["ln2_g"], lp["ln2_b"], H)
        y = ffn_block(y, lp["w1"], lp["b1"], lp["w2"], lp["b2"], lp["ln3_g"], lp["ln3_b"])
    y = layer_norm(y, params["dec_norm_g"], params["dec_norm_b"])

    logits = generator(y, params["gen_w"], params["gen_b"])     # [B, Nt, Vp]
    return logits[..., :V]                                      # slice off lane padding


# ----------------------------------------------------------------------------
# Deterministic parameter init (xavier-uniform style, biases zero)
# ----------------------------------------------------------------------------
def init_params(key, n_enc, n_dec, d_model, n_heads, src_vocab, tgt_vocab, d_ff, max_len):
    keys = iter(jax.random.split(key, 4096))

    def xav(shape, dtype=BF16):
        fan_in, fan_out = shape
        bound = math.sqrt(6.0 / (fan_in + fan_out))
        w = jax.random.uniform(next(keys), shape, jnp.float32, -bound, bound)
        return w.astype(dtype)

    def attn_params():
        return dict(
            wq=xav((d_model, d_model)), bq=jnp.zeros((1, d_model), jnp.float32),
            wkv=xav((d_model, 2 * d_model)), bkv=jnp.zeros((1, 2 * d_model), jnp.float32),
            wo=xav((d_model, d_model)), bo=jnp.zeros((1, d_model), jnp.float32),
        )

    def enc_layer_params():
        return dict(
            self_attn=attn_params(),
            w1=xav((d_model, d_ff)), b1=jnp.zeros((1, d_ff), jnp.float32),
            w2=xav((d_ff, d_model)), b2=jnp.zeros((1, d_model), jnp.float32),
            ln1_g=jnp.ones((1, d_model), jnp.float32), ln1_b=jnp.zeros((1, d_model), jnp.float32),
            ln2_g=jnp.ones((1, d_model), jnp.float32), ln2_b=jnp.zeros((1, d_model), jnp.float32),
        )

    def dec_layer_params():
        p = enc_layer_params()
        p["cross_attn"] = attn_params()
        p["ln3_g"] = jnp.ones((1, d_model), jnp.float32)
        p["ln3_b"] = jnp.zeros((1, d_model), jnp.float32)
        return p

    # sinusoidal positional encoding table (f32)
    pos = jnp.arange(max_len, dtype=jnp.float32)[:, None]
    div = jnp.exp(jnp.arange(0, d_model, 2, dtype=jnp.float32)
                  * (-math.log(10000.0) / d_model))
    pe = jnp.zeros((max_len, d_model), jnp.float32)
    pe = pe.at[:, 0::2].set(jnp.sin(pos * div))
    pe = pe.at[:, 1::2].set(jnp.cos(pos * div))

    # generator weight padded to a 128-lane multiple (zeros beyond vocab)
    v_pad = ((tgt_vocab + 127) // 128) * 128
    gen_w_f32 = jnp.zeros((d_model, v_pad), jnp.float32)
    gen_w_f32 = gen_w_f32.at[:, :tgt_vocab].set(xav((d_model, tgt_vocab), jnp.float32))
    gen_w = gen_w_f32.astype(BF16)
    gen_b = jnp.zeros((1, v_pad), jnp.float32)

    return dict(
        src_emb=xav((src_vocab, d_model), jnp.float32),
        tgt_emb=xav((tgt_vocab, d_model), jnp.float32),
        pe=pe,
        enc_layers=[enc_layer_params() for _ in range(n_enc)],
        dec_layers=[dec_layer_params() for _ in range(n_dec)],
        enc_norm_g=jnp.ones((1, d_model), jnp.float32),
        enc_norm_b=jnp.zeros((1, d_model), jnp.float32),
        dec_norm_g=jnp.ones((1, d_model), jnp.float32),
        dec_norm_b=jnp.zeros((1, d_model), jnp.float32),
        gen_w=gen_w,
        gen_b=gen_b,
    )


# ----------------------------------------------------------------------------
if __name__ == "__main__":
    cfg = dict(
        n_encoder_layers=2,
        n_decoder_layers=2,
        d_model=32,
        n_heads=4,
        src_vocab_size=50,
        tgt_vocab_size=50,
        d_feedforward=64,
    )
    B, Ns, Nt = 2, 8, 8

    root = jax.random.PRNGKey(0)
    k_params, k_src, k_tgt = jax.random.split(root, 3)

    params = init_params(
        k_params,
        cfg["n_encoder_layers"], cfg["n_decoder_layers"],
        cfg["d_model"], cfg["n_heads"],
        cfg["src_vocab_size"], cfg["tgt_vocab_size"],
        cfg["d_feedforward"], max_len=64,
    )

    src = jax.random.randint(k_src, (B, Ns), 0, cfg["src_vocab_size"], dtype=jnp.int32)
    tgt = jax.random.randint(k_tgt, (B, Nt), 0, cfg["tgt_vocab_size"], dtype=jnp.int32)

    # src_mask: no masking; tgt_mask: causal (additive); padding masks: bool [B, N]
    src_mask = jnp.zeros((Ns, Ns), jnp.float32)
    ii = jnp.arange(Nt)[:, None]
    jj = jnp.arange(Nt)[None, :]
    tgt_mask = jnp.where(jj > ii, NEG_INF, 0.0).astype(jnp.float32)
    src_padding_mask = jnp.zeros((B, Ns), bool).at[1, Ns - 1].set(True)
    tgt_padding_mask = jnp.zeros((B, Nt), bool)
    memory_key_padding_mask = src_padding_mask

    fwd_cfg = dict(d_model=cfg["d_model"], n_heads=cfg["n_heads"],
                   tgt_vocab=cfg["tgt_vocab_size"])

    fwd = jax.jit(lambda p, *a: seq2seq_forward(p, fwd_cfg, *a))
    out = fwd(params, src, tgt, src_mask, tgt_mask,
              src_padding_mask, tgt_padding_mask, memory_key_padding_mask)
    out = jax.block_until_ready(out)

    assert out.shape == (B, Nt, cfg["tgt_vocab_size"]), out.shape
    assert bool(jnp.all(jnp.isfinite(out)))
    print("KERNEL_OK")
</pallas_src>

<mosaic_0001>
module attributes {stable_mosaic.version = 11 : i64} {
  func.func @_ln_kernel(%arg0: i32, %arg1: memref<1x8x32xf32, #tpu.memory_space<vmem>>, %arg2: memref<1x32xf32, #tpu.memory_space<vmem>>, %arg3: memref<1x32xf32, #tpu.memory_space<vmem>>, %arg4: memref<1x8x32xf32, #tpu.memory_space<vmem>>) attributes {dimension_semantics = [#tpu.dimension_semantics<parallel>], iteration_bounds = array<i64: 2>, scalar_prefetch = 0 : i64, scratch_operands = 0 : i64, tpu.core_type = #tpu.core_type<tc>, window_params = [{transform_indices = @transform_0, window_bounds = array<i64: 1, 8, 32>}, {pipeline_mode = #tpu.pipeline_mode<synchronous>, transform_indices = @transform_1, window_bounds = array<i64: 1, 32>}, {pipeline_mode = #tpu.pipeline_mode<synchronous>, transform_indices = @transform_2, window_bounds = array<i64: 1, 32>}, {transform_indices = @transform_3, window_bounds = array<i64: 1, 8, 32>}]} {
    %c0 = arith.constant 0 : index
    %c0_0 = arith.constant 0 : index
    %c0_1 = arith.constant 0 : index
    %0 = vector.load %arg1[%c0, %c0_0, %c0_1] : memref<1x8x32xf32, #tpu.memory_space<vmem>>, vector<1x8x32xf32>
    %1 = vector.shape_cast %0 : vector<1x8x32xf32> to vector<8x32xf32>
    %c0_2 = arith.constant 0 : index
    %c0_3 = arith.constant 0 : index
    %2 = vector.load %arg2[%c0_2, %c0_3] : memref<1x32xf32, #tpu.memory_space<vmem>>, vector<1x32xf32>
    %c0_4 = arith.constant 0 : index
    %c0_5 = arith.constant 0 : index
    %3 = vector.load %arg3[%c0_4, %c0_5] : memref<1x32xf32, #tpu.memory_space<vmem>>, vector<1x32xf32>
    %cst = arith.constant dense<0.000000e+00> : vector<8xf32>
    %4 = vector.multi_reduction <add>, %1, %cst [1] : vector<8x32xf32> to vector<8xf32>
    %5 = vector.shape_cast %4 : vector<8xf32> to vector<8x1xf32>
    %cst_6 = arith.constant 3.200000e+01 : f32
    %6 = vector.broadcast %cst_6 : f32 to vector<8x1xf32>
    %7 = arith.divf %5, %6 : vector<8x1xf32>
    %8 = vector.broadcast %7 : vector<8x1xf32> to vector<8x32xf32>
    %9 = arith.subf %1, %8 : vector<8x32xf32>
    %10 = arith.mulf %9, %9 : vector<8x32xf32>
    %cst_7 = arith.constant dense<0.000000e+00> : vector<8xf32>
    %11 = vector.multi_reduction <add>, %10, %cst_7 [1] : vector<8x32xf32> to vector<8xf32>
    %12 = vector.shape_cast %11 : vector<8xf32> to vector<8x1xf32>
    %cst_8 = arith.constant 3.200000e+01 : f32
    %13 = vector.broadcast %cst_8 : f32 to vector<8x1xf32>
    %14 = arith.divf %12, %13 : vector<8x1xf32>
    %15 = vector.broadcast %7 : vector<8x1xf32> to vector<8x32xf32>
    %16 = arith.subf %1, %15 : vector<8x32xf32>
    %cst_9 = arith.constant 9.99999974E-6 : f32
    %17 = vector.broadcast %cst_9 : f32 to vector<8x1xf32>
    %18 = arith.addf %14, %17 : vector<8x1xf32>
    %19 = math.rsqrt %18 : vector<8x1xf32>
    %20 = vector.broadcast %19 : vector<8x1xf32> to vector<8x32xf32>
    %21 = arith.mulf %16, %20 : vector<8x32xf32>
    %22 = vector.broadcast %2 : vector<1x32xf32> to vector<8x32xf32>
    %23 = arith.mulf %21, %22 : vector<8x32xf32>
    %24 = vector.broadcast %3 : vector<1x32xf32> to vector<8x32xf32>
    %25 = arith.addf %23, %24 : vector<8x32xf32>
    %c0_10 = arith.constant 0 : index
    %c0_11 = arith.constant 0 : index
    %c0_12 = arith.constant 0 : index
    %26 = vector.load %arg4[%c0_10, %c0_11, %c0_12] : memref<1x8x32xf32, #tpu.memory_space<vmem>>, vector<1x8x32xf32>
    %27 = vector.shape_cast %26 : vector<1x8x32xf32> to vector<8x32xf32>
    %28 = vector.shape_cast %25 : vector<8x32xf32> to vector<1x8x32xf32>
    tpu.vector_store %arg4[%c0_10, %c0_11, %c0_12], %28 {strides = array<i32>} : memref<1x8x32xf32, #tpu.memory_space<vmem>>, vector<1x8x32xf32>,
    return
  }
  func.func @transform_0(%arg0: i32) -> (i32, i32, i32) {
    %c0_i32 = arith.constant 0 : i32
    %c0_i32_0 = arith.constant 0 : i32
    %c0_i32_1 = arith.constant 0 : i32
    return %arg0, %c0_i32, %c0_i32_0 : i32, i32, i32
  }
  func.func @transform_1(%arg0: i32) -> (i32, i32) {
    %c0_i32 = arith.constant 0 : i32
    %c0_i32_0 = arith.constant 0 : i32
    %c0_i32_1 = arith.constant 0 : i32
    return %c0_i32, %c0_i32_0 : i32, i32
  }
  func.func @transform_2(%arg0: i32) -> (i32, i32) {
    %c0_i32 = arith.constant 0 : i32
    %c0_i32_0 = arith.constant 0 : i32
    %c0_i32_1 = arith.constant 0 : i32
    return %c0_i32, %c0_i32_0 : i32, i32
  }
  func.func @transform_3(%arg0: i32) -> (i32, i32, i32) {
    %c0_i32 = arith.constant 0 : i32
    %c0_i32_0 = arith.constant 0 : i32
    %c0_i32_1 = arith.constant 0 : i32
    return %arg0, %c0_i32, %c0_i32_0 : i32, i32, i32
  }
}

module attributes {stable_mosaic.version = 11 : i64} {
  func.func @_ffn_block_kernel(%arg0: i32, %arg1: memref<1x8x32xf32, #tpu.memory_space<vmem>>, %arg2: memref<32x64xbf16, #tpu.memory_space<vmem>>, %arg3: memref<1x64xf32, #tpu.memory_space<vmem>>, %arg4: memref<64x32xbf16, #tpu.memory_space<vmem>>, %arg5: memref<1x32xf32, #tpu.memory_space<vmem>>, %arg6: memref<1x32xf32, #tpu.memory_space<vmem>>, %arg7: memref<1x32xf32, #tpu.memory_space<vmem>>, %arg8: memref<1x8x32xf32, #tpu.memory_space<vmem>>) attributes {dimension_semantics = [#tpu.dimension_semantics<parallel>], iteration_bounds = array<i64: 2>, scalar_prefetch = 0 : i64, scratch_operands = 0 : i64, tpu.core_type = #tpu.core_type<tc>, window_params = [{transform_indices = @transform_0, window_bounds = array<i64: 1, 8, 32>}, {pipeline_mode = #tpu.pipeline_mode<synchronous>, transform_indices = @transform_1, window_bounds = array<i64: 32, 64>}, {pipeline_mode = #tpu.pipeline_mode<synchronous>, transform_indices = @transform_2, window_bounds = array<i64: 1, 64>}, {pipeline_mode = #tpu.pipeline_mode<synchronous>, transform_indices = @transform_3, window_bounds = array<i64: 64, 32>}, {pipeline_mode = #tpu.pipeline_mode<synchronous>, transform_indices = @transform_4, window_bounds = array<i64: 1, 32>}, {pipeline_mode = #tpu.pipeline_mode<synchronous>, transform_indices = @transform_5, window_bounds = array<i64: 1, 32>}, {pipeline_mode = #tpu.pipeline_mode<synchronous>, transform_indices = @transform_6, window_bounds = array<i64: 1, 32>}, {transform_indices = @transform_7, window_bounds = array<i64: 1, 8, 32>}]} {
    %c0 = arith.constant 0 : index
    %c0_0 = arith.constant 0 : index
    %c0_1 = arith.constant 0 : index
    %0 = vector.load %arg1[%c0, %c0_0, %c0_1] : memref<1x8x32xf32, #tpu.memory_space<vmem>>, vector<1x8x32xf32>
    %1 = vector.shape_cast %0 : vector<1x8x32xf32> to vector<8x32xf32>
    %2 = arith.truncf %1 : vector<8x32xf32> to vector<8x32xbf16>
    %c0_2 = arith.constant 0 : index
    %c0_3 = arith.constant 0 : index
    %3 = vector.load %arg2[%c0_2, %c0_3] : memref<32x64xbf16, #tpu.memory_space<vmem>>, vector<32x64xbf16>
    %cst = arith.constant dense<0.000000e+00> : vector<8x64xf32>
    %4 = tpu.matmul %2, %3, %cst {dimension_numbers = #tpu.dot_dimension_numbers<[1], [0], [0], [1], [0, 0, 1, 1], [], []>} : vector<8x32xbf16>, vector<32x64xbf16>, vector<8x64xf32> -> vector<8x64xf32>
    %c0_4 = arith.constant 0 : index
    %c0_5 = arith.constant 0 : index
    %5 = vector.load %arg3[%c0_4, %c0_5] : memref<1x64xf32, #tpu.memory_space<vmem>>, vector<1x64xf32>
    %6 = vector.broadcast %5 : vector<1x64xf32> to vector<8x64xf32>
    %7 = arith.addf %4, %6 : vector<8x64xf32>
    %cst_6 = arith.constant 0.000000e+00 : f32
    %8 = vector.broadcast %cst_6 : f32 to vector<8x64xf32>
    %9 = arith.maximumf %7, %8 : vector<8x64xf32>
    %10 = arith.truncf %9 : vector<8x64xf32> to vector<8x64xbf16>
    %c0_7 = arith.constant 0 : index
    %c0_8 = arith.constant 0 : index
    %11 = vector.load %arg4[%c0_7, %c0_8] : memref<64x32xbf16, #tpu.memory_space<vmem>>, vector<64x32xbf16>
    %cst_9 = arith.constant dense<0.000000e+00> : vector<8x32xf32>
    %12 = tpu.matmul %10, %11, %cst_9 {dimension_numbers = #tpu.dot_dimension_numbers<[1], [0], [0], [1], [0, 0, 1, 1], [], []>} : vector<8x64xbf16>, vector<64x32xbf16>, vector<8x32xf32> -> vector<8x32xf32>
    %c0_10 = arith.constant 0 : index
    %c0_11 = arith.constant 0 : index
    %13 = vector.load %arg5[%c0_10, %c0_11] : memref<1x32xf32, #tpu.memory_space<vmem>>, vector<1x32xf32>
    %14 = vector.broadcast %13 : vector<1x32xf32> to vector<8x32xf32>
    %15 = arith.addf %12, %14 : vector<8x32xf32>
    %16 = arith.addf %15, %1 : vector<8x32xf32>
    %c0_12 = arith.constant 0 : index
    %c0_13 = arith.constant 0 : index
    %17 = vector.load %arg6[%c0_12, %c0_13] : memref<1x32xf32, #tpu.memory_space<vmem>>, vector<1x32xf32>
    %c0_14 = arith.constant 0 : index
    %c0_15 = arith.constant 0 : index
    %18 = vector.load %arg7[%c0_14, %c0_15] : memref<1x32xf32, #tpu.memory_space<vmem>>, vector<1x32xf32>
    %cst_16 = arith.constant dense<0.000000e+00> : vector<8xf32>
    %19 = vector.multi_reduction <add>, %16, %cst_16 [1] : vector<8x32xf32> to vector<8xf32>
    %20 = vector.shape_cast %19 : vector<8xf32> to vector<8x1xf32>
    %cst_17 = arith.constant 3.200000e+01 : f32
    %21 = vector.broadcast %cst_17 : f32 to vector<8x1xf32>
    %22 = arith.divf %20, %21 : vector<8x1xf32>
    %23 = vector.broadcast %22 : vector<8x1xf32> to vector<8x32xf32>
    %24 = arith.subf %16, %23 : vector<8x32xf32>
    %25 = arith.mulf %24, %24 : vector<8x32xf32>
    %cst_18 = arith.constant dense<0.000000e+00> : vector<8xf32>
    %26 = vector.multi_reduction <add>, %25, %cst_18 [1] : vector<8x32xf32> to vector<8xf32>
    %27 = vector.shape_cast %26 : vector<8xf32> to vector<8x1xf32>
    %cst_19 = arith.constant 3.200000e+01 : f32
    %28 = vector.broadcast %cst_19 : f32 to vector<8x1xf32>
    %29 = arith.divf %27, %28 : vector<8x1xf32>
    %30 = vector.broadcast %22 : vector<8x1xf32> to vector<8x32xf32>
    %31 = arith.subf %16, %30 : vector<8x32xf32>
    %cst_20 = arith.constant 9.99999974E-6 : f32
    %32 = vector.broadcast %cst_20 : f32 to vector<8x1xf32>
    %33 = arith.addf %29, %32 : vector<8x1xf32>
    %34 = math.rsqrt %33 : vector<8x1xf32>
    %35 = vector.broadcast %34 : vector<8x1xf32> to vector<8x32xf32>
    %36 = arith.mulf %31, %35 : vector<8x32xf32>
    %37 = vector.broadcast %17 : vector<1x32xf32> to vector<8x32xf32>
    %38 = arith.mulf %36, %37 : vector<8x32xf32>
    %39 = vector.broadcast %18 : vector<1x32xf32> to vector<8x32xf32>
    %40 = arith.addf %38, %39 : vector<8x32xf32>
    %c0_21 = arith.constant 0 : index
    %c0_22 = arith.constant 0 : index
    %c0_23 = arith.constant 0 : index
    %41 = vector.load %arg8[%c0_21, %c0_22, %c0_23] : memref<1x8x32xf32, #tpu.memory_space<vmem>>, vector<1x8x32xf32>
    %42 = vector.shape_cast %41 : vector<1x8x32xf32> to vector<8x32xf32>
    %43 = vector.shape_cast %40 : vector<8x32xf32> to vector<1x8x32xf32>
    tpu.vector_store %arg8[%c0_21, %c0_22, %c0_23], %43 {strides = array<i32>} : memref<1x8x32xf32, #tpu.memory_space<vmem>>, vector<1x8x32xf32>,
    return
  }
  func.func @transform_0(%arg0: i32) -> (i32, i32, i32) {
    %c0_i32 = arith.constant 0 : i32
    %c0_i32_0 = arith.constant 0 : i32
    %c0_i32_1 = arith.constant 0 : i32
    return %arg0, %c0_i32, %c0_i32_0 : i32, i32, i32
  }
  func.func @transform_1(%arg0: i32) -> (i32, i32) {
    %c0_i32 = arith.constant 0 : i32
    %c0_i32_0 = arith.constant 0 : i32
    %c0_i32_1 = arith.constant 0 : i32
    return %c0_i32, %c0_i32_0 : i32, i32
  }
  func.func @transform_2(%arg0: i32) -> (i32, i32) {
    %c0_i32 = arith.constant 0 : i32
    %c0_i32_0 = arith.constant 0 : i32
    %c0_i32_1 = arith.constant 0 : i32
    return %c0_i32, %c0_i32_0 : i32, i32
  }
  func.func @transform_3(%arg0: i32) -> (i32, i32) {
    %c0_i32 = arith.constant 0 : i32
    %c0_i32_0 = arith.constant 0 : i32
    %c0_i32_1 = arith.constant 0 : i32
    return %c0_i32, %c0_i32_0 : i32, i32
  }
  func.func @transform_4(%arg0: i32) -> (i32, i32) {
    %c0_i32 = arith.constant 0 : i32
    %c0_i32_0 = arith.constant 0 : i32
    %c0_i32_1 = arith.constant 0 : i32
    return %c0_i32, %c0_i32_0 : i32, i32
  }
  func.func @transform_5(%arg0: i32) -> (i32, i32) {
    %c0_i32 = arith.constant 0 : i32
    %c0_i32_0 = arith.constant 0 : i32
    %c0_i32_1 = arith.constant 0 : i32
    return %c0_i32, %c0_i32_0 : i32, i32
  }
  func.func @transform_6(%arg0: i32) -> (i32, i32) {
    %c0_i32 = arith.constant 0 : i32
    %c0_i32_0 = arith.constant 0 : i32
    %c0_i32_1 = arith.constant 0 : i32
    return %c0_i32, %c0_i32_0 : i32, i32
  }
  func.func @transform_7(%arg0: i32) -> (i32, i32, i32) {
    %c0_i32 = arith.constant 0 : i32
    %c0_i32_0 = arith.constant 0 : i32
    %c0_i32_1 = arith.constant 0 : i32
    return %arg0, %c0_i32, %c0_i32_0 : i32, i32, i32
  }
}

module attributes {stable_mosaic.version = 11 : i64} {
  func.func @_mha_block_kernel(%arg0: i32, %arg1: memref<1x8x32xf32, #tpu.memory_space<vmem>>, %arg2: memref<1x8x32xf32, #tpu.memory_space<vmem>>, %arg3: memref<32x32xbf16, #tpu.memory_space<vmem>>, %arg4: memref<1x32xf32, #tpu.memory_space<vmem>>, %arg5: memref<32x64xbf16, #tpu.memory_space<vmem>>, %arg6: memref<1x64xf32, #tpu.memory_space<vmem>>, %arg7: memref<32x32xbf16, #tpu.memory_space<vmem>>, %arg8: memref<1x32xf32, #tpu.memory_space<vmem>>, %arg9: memref<1x1x8x8xf32, #tpu.memory_space<vmem>>, %arg10: memref<1x32xf32, #tpu.memory_space<vmem>>, %arg11: memref<1x32xf32, #tpu.memory_space<vmem>>, %arg12: memref<1x8x32xf32, #tpu.memory_space<vmem>>) attributes {dimension_semantics = [#tpu.dimension_semantics<parallel>], iteration_bounds = array<i64: 2>, scalar_prefetch = 0 : i64, scratch_operands = 0 : i64, tpu.core_type = #tpu.core_type<tc>, window_params = [{transform_indices = @transform_0, window_bounds = array<i64: 1, 8, 32>}, {transform_indices = @transform_1, window_bounds = array<i64: 1, 8, 32>}, {pipeline_mode = #tpu.pipeline_mode<synchronous>, transform_indices = @transform_2, window_bounds = array<i64: 32, 32>}, {pipeline_mode = #tpu.pipeline_mode<synchronous>, transform_indices = @transform_3, window_bounds = array<i64: 1, 32>}, {pipeline_mode = #tpu.pipeline_mode<synchronous>, transform_indices = @transform_4, window_bounds = array<i64: 32, 64>}, {pipeline_mode = #tpu.pipeline_mode<synchronous>, transform_indices = @transform_5, window_bounds = array<i64: 1, 64>}, {pipeline_mode = #tpu.pipeline_mode<synchronous>, transform_indices = @transform_6, window_bounds = array<i64: 32, 32>}, {pipeline_mode = #tpu.pipeline_mode<synchronous>, transform_indices = @transform_7, window_bounds = array<i64: 1, 32>}, {transform_indices = @transform_8, window_bounds = array<i64: 1, 1, 8, 8>}, {pipeline_mode = #tpu.pipeline_mode<synchronous>, transform_indices = @transform_9, window_bounds = array<i64: 1, 32>}, {pipeline_mode = #tpu.pipeline_mode<synchronous>, transform_indices = @transform_10, window_bounds = array<i64: 1, 32>}, {transform_indices = @transform_11, window_bounds = array<i64: 1, 8, 32>}]} {
    %c0 = arith.constant 0 : index
    %c0_0 = arith.constant 0 : index
    %c0_1 = arith.constant 0 : index
    %0 = vector.load %arg1[%c0, %c0_0, %c0_1] : memref<1x8x32xf32, #tpu.memory_space<vmem>>, vector<1x8x32xf32>
    %1 = vector.shape_cast %0 : vector<1x8x32xf32> to vector<8x32xf32>
    %c0_2 = arith.constant 0 : index
    %c0_3 = arith.constant 0 : index
    %c0_4 = arith.constant 0 : index
    %2 = vector.load %arg2[%c0_2, %c0_3, %c0_4] : memref<1x8x32xf32, #tpu.memory_space<vmem>>, vector<1x8x32xf32>
    %3 = vector.shape_cast %2 : vector<1x8x32xf32> to vector<8x32xf32>
    %4 = arith.truncf %1 : vector<8x32xf32> to vector<8x32xbf16>
    %c0_5 = arith.constant 0 : index
    %c0_6 = arith.constant 0 : index
    %5 = vector.load %arg3[%c0_5, %c0_6] : memref<32x32xbf16, #tpu.memory_space<vmem>>, vector<32x32xbf16>
    %cst = arith.constant dense<0.000000e+00> : vector<8x32xf32>
    %6 = tpu.matmul %4, %5, %cst {dimension_numbers = #tpu.dot_dimension_numbers<[1], [0], [0], [1], [0, 0, 1, 1], [], []>} : vector<8x32xbf16>, vector<32x32xbf16>, vector<8x32xf32> -> vector<8x32xf32>
    %c0_7 = arith.constant 0 : index
    %c0_8 = arith.constant 0 : index
    %7 = vector.load %arg4[%c0_7, %c0_8] : memref<1x32xf32, #tpu.memory_space<vmem>>, vector<1x32xf32>
    %8 = vector.broadcast %7 : vector<1x32xf32> to vector<8x32xf32>
    %9 = arith.addf %6, %8 : vector<8x32xf32>
    %10 = arith.truncf %3 : vector<8x32xf32> to vector<8x32xbf16>
    %c0_9 = arith.constant 0 : index
    %c0_10 = arith.constant 0 : index
    %11 = vector.load %arg5[%c0_9, %c0_10] : memref<32x64xbf16, #tpu.memory_space<vmem>>, vector<32x64xbf16>
    %cst_11 = arith.constant dense<0.000000e+00> : vector<8x64xf32>
    %12 = tpu.matmul %10, %11, %cst_11 {dimension_numbers = #tpu.dot_dimension_numbers<[1], [0], [0], [1], [0, 0, 1, 1], [], []>} : vector<8x32xbf16>, vector<32x64xbf16>, vector<8x64xf32> -> vector<8x64xf32>
    %c0_12 = arith.constant 0 : index
    %c0_13 = arith.constant 0 : index
    %13 = vector.load %arg6[%c0_12, %c0_13] : memref<1x64xf32, #tpu.memory_space<vmem>>, vector<1x64xf32>
    %14 = vector.broadcast %13 : vector<1x64xf32> to vector<8x64xf32>
    %15 = arith.addf %12, %14 : vector<8x64xf32>
    %c0_14 = arith.constant 0 : index
    %c0_15 = arith.constant 0 : index
    %c0_16 = arith.constant 0 : index
    %c0_17 = arith.constant 0 : index
    %16 = vector.load %arg9[%c0_14, %c0_15, %c0_16, %c0_17] : memref<1x1x8x8xf32, #tpu.memory_space<vmem>>, vector<1x1x8x8xf32>
    %17 = vector.shape_cast %16 : vector<1x1x8x8xf32> to vector<8x8xf32>
    %cst_18 = arith.constant 0.000000e+00 : f32
    %18 = vector.broadcast %cst_18 : f32 to vector<8x32xf32>
    %19 = vector.extract_strided_slice %9 {offsets = [0, 0], sizes = [8, 8], strides = [1, 1]} : vector<8x32xf32> to vector<8x8xf32>
    %20 = vector.extract_strided_slice %15 {offsets = [0, 0], sizes = [8, 8], strides = [1, 1]} : vector<8x64xf32> to vector<8x8xf32>
    %21 = vector.extract_strided_slice %15 {offsets = [0, 32], sizes = [8, 8], strides = [1, 1]} : vector<8x64xf32> to vector<8x8xf32>
    %22 = tpu.transpose %20, [1, 0] : vector<8x8xf32> -> vector<8x8xf32>
    %cst_19 = arith.constant dense<0.000000e+00> : vector<8x8xf32>
    %23 = tpu.matmul %19, %22, %cst_19 {dimension_numbers = #tpu.dot_dimension_numbers<[1], [0], [0], [1], [0, 0, 1, 1], [], []>} : vector<8x8xf32>, vector<8x8xf32>, vector<8x8xf32> -> vector<8x8xf32>
    %cst_20 = arith.constant 0.353553385 : f32
    %24 = vector.broadcast %cst_20 : f32 to vector<8x8xf32>
    %25 = arith.mulf %23, %24 : vector<8x8xf32>
    %26 = arith.addf %25, %17 : vector<8x8xf32>
    %cst_21 = arith.constant dense<0xFF800000> : vector<8xf32>
    %27 = vector.multi_reduction <maximumf>, %26, %cst_21 [1] : vector<8x8xf32> to vector<8xf32>
    %28 = vector.shape_cast %27 : vector<8xf32> to vector<8x1xf32>
    %29 = vector.broadcast %28 : vector<8x1xf32> to vector<8x8xf32>
    %30 = arith.subf %26, %29 : vector<8x8xf32>
    %31 = math.exp %30 : vector<8x8xf32>
    %cst_22 = arith.constant dense<0.000000e+00> : vector<8xf32>
    %32 = vector.multi_reduction <add>, %31, %cst_22 [1] : vector<8x8xf32> to vector<8xf32>
    %33 = vector.shape_cast %32 : vector<8xf32> to vector<8x1xf32>
    %34 = tpu.reciprocal %33 {approx = true} : vector<8x1xf32> -> vector<8x1xf32>
    %35 = vector.broadcast %34 : vector<8x1xf32> to vector<8x8xf32>
    %36 = arith.mulf %31, %35 : vector<8x8xf32>
    %cst_23 = arith.constant dense<0.000000e+00> : vector<8x8xf32>
    %37 = tpu.matmul %36, %21, %cst_23 {dimension_numbers = #tpu.dot_dimension_numbers<[1], [0], [0], [1], [0, 0, 1, 1], [], []>} : vector<8x8xf32>, vector<8x8xf32>, vector<8x8xf32> -> vector<8x8xf32>
    %38 = arith.truncf %37 : vector<8x8xf32> to vector<8x8xbf16>
    %c0_24 = arith.constant 0 : index
    %c0_25 = arith.constant 0 : index
    %39 = vector.load %arg7[%c0_24, %c0_25] : memref<32x32xbf16, #tpu.memory_space<vmem>>, vector<8x32xbf16>
    %cst_26 = arith.constant dense<0.000000e+00> : vector<8x32xf32>
    %40 = tpu.matmul %38, %39, %cst_26 {dimension_numbers = #tpu.dot_dimension_numbers<[1], [0], [0], [1], [0, 0, 1, 1], [], []>} : vector<8x8xbf16>, vector<8x32xbf16>, vector<8x32xf32> -> vector<8x32xf32>
    %41 = arith.addf %18, %40 : vector<8x32xf32>
    %42 = vector.extract_strided_slice %9 {offsets = [0, 8], sizes = [8, 8], strides = [1, 1]} : vector<8x32xf32> to vector<8x8xf32>
    %43 = vector.extract_strided_slice %15 {offsets = [0, 8], sizes = [8, 8], strides = [1, 1]} : vector<8x64xf32> to vector<8x8xf32>
    %44 = vector.extract_strided_slice %15 {offsets = [0, 40], sizes = [8, 8], strides = [1, 1]} : vector<8x64xf32> to vector<8x8xf32>
    %45 = tpu.transpose %43, [1, 0] : vector<8x8xf32> -> vector<8x8xf32>
    %cst_27 = arith.constant dense<0.000000e+00> : vector<8x8xf32>
    %46 = tpu.matmul %42, %45, %cst_27 {dimension_numbers = #tpu.dot_dimension_numbers<[1], [0], [0], [1], [0, 0, 1, 1], [], []>} : vector<8x8xf32>, vector<8x8xf32>, vector<8x8xf32> -> vector<8x8xf32>
    %cst_28 = arith.constant 0.353553385 : f32
    %47 = vector.broadcast %cst_28 : f32 to vector<8x8xf32>
    %48 = arith.mulf %46, %47 : vector<8x8xf32>
    %49 = arith.addf %48, %17 : vector<8x8xf32>
    %cst_29 = arith.constant dense<0xFF800000> : vector<8xf32>
    %50 = vector.multi_reduction <maximumf>, %49, %cst_29 [1] : vector<8x8xf32> to vector<8xf32>
    %51 = vector.shape_cast %50 : vector<8xf32> to vector<8x1xf32>
    %52 = vector.broadcast %51 : vector<8x1xf32> to vector<8x8xf32>
    %53 = arith.subf %49, %52 : vector<8x8xf32>
    %54 = math.exp %53 : vector<8x8xf32>
    %cst_30 = arith.constant dense<0.000000e+00> : vector<8xf32>
    %55 = vector.multi_reduction <add>, %54, %cst_30 [1] : vector<8x8xf32> to vector<8xf32>
    %56 = vector.shape_cast %55 : vector<8xf32> to vector<8x1xf32>
    %57 = tpu.reciprocal %56 {approx = true} : vector<8x1xf32> -> vector<8x1xf32>
    %58 = vector.broadcast %57 : vector<8x1xf32> to vector<8x8xf32>
    %59 = arith.mulf %54, %58 : vector<8x8xf32>
    %cst_31 = arith.constant dense<0.000000e+00> : vector<8x8xf32>
    %60 = tpu.matmul %59, %44, %cst_31 {dimension_numbers = #tpu.dot_dimension_numbers<[1], [0], [0], [1], [0, 0, 1, 1], [], []>} : vector<8x8xf32>, vector<8x8xf32>, vector<8x8xf32> -> vector<8x8xf32>
    %61 = arith.truncf %60 : vector<8x8xf32> to vector<8x8xbf16>
    %c8 = arith.constant 8 : index
    %c0_32 = arith.constant 0 : index
    %62 = vector.load %arg7[%c8, %c0_32] : memref<32x32xbf16, #tpu.memory_space<vmem>>, vector<8x32xbf16>
    %cst_33 = arith.constant dense<0.000000e+00> : vector<8x32xf32>
    %63 = tpu.matmul %61, %62, %cst_33 {dimension_numbers = #tpu.dot_dimension_numbers<[1], [0], [0], [1], [0, 0, 1, 1], [], []>} : vector<8x8xbf16>, vector<8x32xbf16>, vector<8x32xf32> -> vector<8x32xf32>
    %64 = arith.addf %41, %63 : vector<8x32xf32>
    %65 = vector.extract_strided_slice %9 {offsets = [0, 16], sizes = [8, 8], strides = [1, 1]} : vector<8x32xf32> to vector<8x8xf32>
    %66 = vector.extract_strided_slice %15 {offsets = [0, 16], sizes = [8, 8], strides = [1, 1]} : vector<8x64xf32> to vector<8x8xf32>
    %67 = vector.extract_strided_slice %15 {offsets = [0, 48], sizes = [8, 8], strides = [1, 1]} : vector<8x64xf32> to vector<8x8xf32>
    %68 = tpu.transpose %66, [1, 0] : vector<8x8xf32> -> vector<8x8xf32>
    %cst_34 = arith.constant dense<0.000000e+00> : vector<8x8xf32>
    %69 = tpu.matmul %65, %68, %cst_34 {dimension_numbers = #tpu.dot_dimension_numbers<[1], [0], [0], [1], [0, 0, 1, 1], [], []>} : vector<8x8xf32>, vector<8x8xf32>, vector<8x8xf32> -> vector<8x8xf32>
    %cst_35 = arith.constant 0.353553385 : f32
    %70 = vector.broadcast %cst_35 : f32 to vector<8x8xf32>
    %71 = arith.mulf %69, %70 : vector<8x8xf32>
    %72 = arith.addf %71, %17 : vector<8x8xf32>
    %cst_36 = arith.constant dense<0xFF800000> : vector<8xf32>
    %73 = vector.multi_reduction <maximumf>, %72, %cst_36 [1] : vector<8x8xf32> to vector<8xf32>
    %74 = vector.shape_cast %73 : vector<8xf32> to vector<8x1xf32>
    %75 = vector.broadcast %74 : vector<8x1xf32> to vector<8x8xf32>
    %76 = arith.subf %72, %75 : vector<8x8xf32>
    %77 = math.exp %76 : vector<8x8xf32>
    %cst_37 = arith.constant dense<0.000000e+00> : vector<8xf32>
    %78 = vector.multi_reduction <add>, %77, %cst_37 [1] : vector<8x8xf32> to vector<8xf32>
    %79 = vector.shape_cast %78 : vector<8xf32> to vector<8x1xf32>
    %80 = tpu.reciprocal %79 {approx = true} : vector<8x1xf32> -> vector<8x1xf32>
    %81 = vector.broadcast %80 : vector<8x1xf32> to vector<8x8xf32>
    %82 = arith.mulf %77, %81 : vector<8x8xf32>
    %cst_38 = arith.constant dense<0.000000e+00> : vector<8x8xf32>
    %83 = tpu.matmul %82, %67, %cst_38 {dimension_numbers = #tpu.dot_dimension_numbers<[1], [0], [0], [1], [0, 0, 1, 1], [], []>} : vector<8x8xf32>, vector<8x8xf32>, vector<8x8xf32> -> vector<8x8xf32>
    %84 = arith.truncf %83 : vector<8x8xf32> to vector<8x8xbf16>
    %c16 = arith.constant 16 : index
    %c0_39 = arith.constant 0 : index
    %85 = vector.load %arg7[%c16, %c0_39] : memref<32x32xbf16, #tpu.memory_space<vmem>>, vector<8x32xbf16>
    %cst_40 = arith.constant dense<0.000000e+00> : vector<8x32xf32>
    %86 = tpu.matmul %84, %85, %cst_40 {dimension_numbers = #tpu.dot_dimension_numbers<[1], [0], [0], [1], [0, 0, 1, 1], [], []>} : vector<8x8xbf16>, vector<8x32xbf16>, vector<8x32xf32> -> vector<8x32xf32>
    %87 = arith.addf %64, %86 : vector<8x32xf32>
    %88 = vector.extract_strided_slice %9 {offsets = [0, 24], sizes = [8, 8], strides = [1, 1]} : vector<8x32xf32> to vector<8x8xf32>
    %89 = vector.extract_strided_slice %15 {offsets = [0, 24], sizes = [8, 8], strides = [1, 1]} : vector<8x64xf32> to vector<8x8xf32>
    %90 = vector.extract_strided_slice %15 {offsets = [0, 56], sizes = [8, 8], strides = [1, 1]} : vector<8x64xf32> to vector<8x8xf32>
    %91 = tpu.transpose %89, [1, 0] : vector<8x8xf32> -> vector<8x8xf32>
    %cst_41 = arith.constant dense<0.000000e+00> : vector<8x8xf32>
    %92 = tpu.matmul %88, %91, %cst_41 {dimension_numbers = #tpu.dot_dimension_numbers<[1], [0], [0], [1], [0, 0, 1, 1], [], []>} : vector<8x8xf32>, vector<8x8xf32>, vector<8x8xf32> -> vector<8x8xf32>
    %cst_42 = arith.constant 0.353553385 : f32
    %93 = vector.broadcast %cst_42 : f32 to vector<8x8xf32>
    %94 = arith.mulf %92, %93 : vector<8x8xf32>
    %95 = arith.addf %94, %17 : vector<8x8xf32>
    %cst_43 = arith.constant dense<0xFF800000> : vector<8xf32>
    %96 = vector.multi_reduction <maximumf>, %95, %cst_43 [1] : vector<8x8xf32> to vector<8xf32>
    %97 = vector.shape_cast %96 : vector<8xf32> to vector<8x1xf32>
    %98 = vector.broadcast %97 : vector<8x1xf32> to vector<8x8xf32>
    %99 = arith.subf %95, %98 : vector<8x8xf32>
    %100 = math.exp %99 : vector<8x8xf32>
    %cst_44 = arith.constant dense<0.000000e+00> : vector<8xf32>
    %101 = vector.multi_reduction <add>, %100, %cst_44 [1] : vector<8x8xf32> to vector<8xf32>
    %102 = vector.shape_cast %101 : vector<8xf32> to vector<8x1xf32>
    %103 = tpu.reciprocal %102 {approx = true} : vector<8x1xf32> -> vector<8x1xf32>
    %104 = vector.broadcast %103 : vector<8x1xf32> to vector<8x8xf32>
    %105 = arith.mulf %100, %104 : vector<8x8xf32>
    %cst_45 = arith.constant dense<0.000000e+00> : vector<8x8xf32>
    %106 = tpu.matmul %105, %90, %cst_45 {dimension_numbers = #tpu.dot_dimension_numbers<[1], [0], [0], [1], [0, 0, 1, 1], [], []>} : vector<8x8xf32>, vector<8x8xf32>, vector<8x8xf32> -> vector<8x8xf32>
    %107 = arith.truncf %106 : vector<8x8xf32> to vector<8x8xbf16>
    %c24 = arith.constant 24 : index
    %c0_46 = arith.constant 0 : index
    %108 = vector.load %arg7[%c24, %c0_46] : memref<32x32xbf16, #tpu.memory_space<vmem>>, vector<8x32xbf16>
    %cst_47 = arith.constant dense<0.000000e+00> : vector<8x32xf32>
    %109 = tpu.matmul %107, %108, %cst_47 {dimension_numbers = #tpu.dot_dimension_numbers<[1], [0], [0], [1], [0, 0, 1, 1], [], []>} : vector<8x8xbf16>, vector<8x32xbf16>, vector<8x32xf32> -> vector<8x32xf32>
    %110 = arith.addf %87, %109 : vector<8x32xf32>
    %c0_48 = arith.constant 0 : index
    %c0_49 = arith.constant 0 : index
    %111 = vector.load %arg8[%c0_48, %c0_49] : memref<1x32xf32, #tpu.memory_space<vmem>>, vector<1x32xf32>
    %112 = vector.broadcast %111 : vector<1x32xf32> to vector<8x32xf32>
    %113 = arith.addf %110, %112 : vector<8x32xf32>
    %114 = arith.addf %113, %1 : vector<8x32xf32>
    %c0_50 = arith.constant 0 : index
    %c0_51 = arith.constant 0 : index
    %115 = vector.load %arg10[%c0_50, %c0_51] : memref<1x32xf32, #tpu.memory_space<vmem>>, vector<1x32xf32>
    %c0_52 = arith.constant 0 : index
    %c0_53 = arith.constant 0 : index
    %116 = vector.load %arg11[%c0_52, %c0_53] : memref<1x32xf32, #tpu.memory_space<vmem>>, vector<1x32xf32>
    %cst_54 = arith.constant dense<0.000000e+00> : vector<8xf32>
    %117 = vector.multi_reduction <add>, %114, %cst_54 [1] : vector<8x32xf32> to vector<8xf32>
    %118 = vector.shape_cast %117 : vector<8xf32> to vector<8x1xf32>
    %cst_55 = arith.constant 3.200000e+01 : f32
    %119 = vector.broadcast %cst_55 : f32 to vector<8x1xf32>
    %120 = arith.divf %118, %119 : vector<8x1xf32>
    %121 = vector.broadcast %120 : vector<8x1xf32> to vector<8x32xf32>
    %122 = arith.subf %114, %121 : vector<8x32xf32>
    %123 = arith.mulf %122, %122 : vector<8x32xf32>
    %cst_56 = arith.constant dense<0.000000e+00> : vector<8xf32>
    %124 = vector.multi_reduction <add>, %123, %cst_56 [1] : vector<8x32xf32> to vector<8xf32>
    %125 = vector.shape_cast %124 : vector<8xf32> to vector<8x1xf32>
    %cst_57 = arith.constant 3.200000e+01 : f32
    %126 = vector.broadcast %cst_57 : f32 to vector<8x1xf32>
    %127 = arith.divf %125, %126 : vector<8x1xf32>
    %128 = vector.broadcast %120 : vector<8x1xf32> to vector<8x32xf32>
    %129 = arith.subf %114, %128 : vector<8x32xf32>
    %cst_58 = arith.constant 9.99999974E-6 : f32
    %130 = vector.broadcast %cst_58 : f32 to vector<8x1xf32>
    %131 = arith.addf %127, %130 : vector<8x1xf32>
    %132 = math.rsqrt %131 : vector<8x1xf32>
    %133 = vector.broadcast %132 : vector<8x1xf32> to vector<8x32xf32>
    %134 = arith.mulf %129, %133 : vector<8x32xf32>
    %135 = vector.broadcast %115 : vector<1x32xf32> to vector<8x32xf32>
    %136 = arith.mulf %134, %135 : vector<8x32xf32>
    %137 = vector.broadcast %116 : vector<1x32xf32> to vector<8x32xf32>
    %138 = arith.addf %136, %137 : vector<8x32xf32>
    %c0_59 = arith.constant 0 : index
    %c0_60 = arith.constant 0 : index
    %c0_61 = arith.constant 0 : index
    %139 = vector.load %arg12[%c0_59, %c0_60, %c0_61] : memref<1x8x32xf32, #tpu.memory_space<vmem>>, vector<1x8x32xf32>
    %140 = vector.shape_cast %139 : vector<1x8x32xf32> to vector<8x32xf32>
    %141 = vector.shape_cast %138 : vector<8x32xf32> to vector<1x8x32xf32>
    tpu.vector_store %arg12[%c0_59, %c0_60, %c0_61], %141 {strides = array<i32>} : memref<1x8x32xf32, #tpu.memory_space<vmem>>, vector<1x8x32xf32>,
    return
  }
  func.func @transform_0(%arg0: i32) -> (i32, i32, i32) {
    %c0_i32 = arith.constant 0 : i32
    %c0_i32_0 = arith.constant 0 : i32
    %c0_i32_1 = arith.constant 0 : i32
    return %arg0, %c0_i32, %c0_i32_0 : i32, i32, i32
  }
  func.func @transform_1(%arg0: i32) -> (i32, i32, i32) {
    %c0_i32 = arith.constant 0 : i32
    %c0_i32_0 = arith.constant 0 : i32
    %c0_i32_1 = arith.constant 0 : i32
    return %arg0, %c0_i32, %c0_i32_0 : i32, i32, i32
  }
  func.func @transform_2(%arg0: i32) -> (i32, i32) {
    %c0_i32 = arith.constant 0 : i32
    %c0_i32_0 = arith.constant 0 : i32
    %c0_i32_1 = arith.constant 0 : i32
    return %c0_i32, %c0_i32_0 : i32, i32
  }
  func.func @transform_3(%arg0: i32) -> (i32, i32) {
    %c0_i32 = arith.constant 0 : i32
    %c0_i32_0 = arith.constant 0 : i32
    %c0_i32_1 = arith.constant 0 : i32
    return %c0_i32, %c0_i32_0 : i32, i32
  }
  func.func @transform_4(%arg0: i32) -> (i32, i32) {
    %c0_i32 = arith.constant 0 : i32
    %c0_i32_0 = arith.constant 0 : i32
    %c0_i32_1 = arith.constant 0 : i32
    return %c0_i32, %c0_i32_0 : i32, i32
  }
  func.func @transform_5(%arg0: i32) -> (i32, i32) {
    %c0_i32 = arith.constant 0 : i32
    %c0_i32_0 = arith.constant 0 : i32
    %c0_i32_1 = arith.constant 0 : i32
    return %c0_i32, %c0_i32_0 : i32, i32
  }
  func.func @transform_6(%arg0: i32) -> (i32, i32) {
    %c0_i32 = arith.constant 0 : i32
    %c0_i32_0 = arith.constant 0 : i32
    %c0_i32_1 = arith.constant 0 : i32
    return %c0_i32, %c0_i32_0 : i32, i32
  }
  func.func @transform_7(%arg0: i32) -> (i32, i32) {
    %c0_i32 = arith.constant 0 : i32
    %c0_i32_0 = arith.constant 0 : i32
    %c0_i32_1 = arith.constant 0 : i32
    return %c0_i32, %c0_i32_0 : i32, i32
  }
  func.func @transform_8(%arg0: i32) -> (i32, i32, i32, i32) {
    %c0_i32 = arith.constant 0 : i32
    %c0_i32_0 = arith.constant 0 : i32
    %c0_i32_1 = arith.constant 0 : i32
    %c0_i32_2 = arith.constant 0 : i32
    return %arg0, %c0_i32, %c0_i32_0, %c0_i32_1 : i32, i32, i32, i32
  }
  func.func @transform_9(%arg0: i32) -> (i32, i32) {
    %c0_i32 = arith.constant 0 : i32
    %c0_i32_0 = arith.constant 0 : i32
    %c0_i32_1 = arith.constant 0 : i32
    return %c0_i32, %c0_i32_0 : i32, i32
  }
  func.func @transform_10(%arg0: i32) -> (i32, i32) {
    %c0_i32 = arith.constant 0 : i32
    %c0_i32_0 = arith.constant 0 : i32
    %c0_i32_1 = arith.constant 0 : i32
    return %c0_i32, %c0_i32_0 : i32, i32
  }
  func.func @transform_11(%arg0: i32) -> (i32, i32, i32) {
    %c0_i32 = arith.constant 0 : i32
    %c0_i32_0 = arith.constant 0 : i32
    %c0_i32_1 = arith.constant 0 : i32
    return %arg0, %c0_i32, %c0_i32_0 : i32, i32, i32
  }
}

module attributes {stable_mosaic.version = 11 : i64} {
  func.func @_generator_kernel(%arg0: i32, %arg1: memref<1x8x32xf32, #tpu.memory_space<vmem>>, %arg2: memref<32x128xbf16, #tpu.memory_space<vmem>>, %arg3: memref<1x128xf32, #tpu.memory_space<vmem>>, %arg4: memref<1x8x128xf32, #tpu.memory_space<vmem>>) attributes {dimension_semantics = [#tpu.dimension_semantics<parallel>], iteration_bounds = array<i64: 2>, scalar_prefetch = 0 : i64, scratch_operands = 0 : i64, tpu.core_type = #tpu.core_type<tc>, window_params = [{transform_indices = @transform_0, window_bounds = array<i64: 1, 8, 32>}, {pipeline_mode = #tpu.pipeline_mode<synchronous>, transform_indices = @transform_1, window_bounds = array<i64: 32, 128>}, {pipeline_mode = #tpu.pipeline_mode<synchronous>, transform_indices = @transform_2, window_bounds = array<i64: 1, 128>}, {transform_indices = @transform_3, window_bounds = array<i64: 1, 8, 128>}]} {
    %c0 = arith.constant 0 : index
    %c0_0 = arith.constant 0 : index
    %c0_1 = arith.constant 0 : index
    %0 = vector.load %arg1[%c0, %c0_0, %c0_1] : memref<1x8x32xf32, #tpu.memory_space<vmem>>, vector<1x8x32xf32>
    %1 = vector.shape_cast %0 : vector<1x8x32xf32> to vector<8x32xf32>
    %2 = arith.truncf %1 : vector<8x32xf32> to vector<8x32xbf16>
    %c0_2 = arith.constant 0 : index
    %c0_3 = arith.constant 0 : index
    %3 = vector.load %arg2[%c0_2, %c0_3] : memref<32x128xbf16, #tpu.memory_space<vmem>>, vector<32x128xbf16>
    %cst = arith.constant dense<0.000000e+00> : vector<8x128xf32>
    %4 = tpu.matmul %2, %3, %cst {dimension_numbers = #tpu.dot_dimension_numbers<[1], [0], [0], [1], [0, 0, 1, 1], [], []>} : vector<8x32xbf16>, vector<32x128xbf16>, vector<8x128xf32> -> vector<8x128xf32>
    %c0_4 = arith.constant 0 : index
    %c0_5 = arith.constant 0 : index
    %5 = vector.load %arg3[%c0_4, %c0_5] : memref<1x128xf32, #tpu.memory_space<vmem>>, vector<1x128xf32>
    %6 = vector.broadcast %5 : vector<1x128xf32> to vector<8x128xf32>
    %7 = arith.addf %4, %6 : vector<8x128xf32>
    %c0_6 = arith.constant 0 : index
    %c0_7 = arith.constant 0 : index
    %c0_8 = arith.constant 0 : index
    %8 = vector.load %arg4[%c0_6, %c0_7, %c0_8] : memref<1x8x128xf32, #tpu.memory_space<vmem>>, vector<1x8x128xf32>
    %9 = vector.shape_cast %8 : vector<1x8x128xf32> to vector<8x128xf32>
    %10 = vector.shape_cast %7 : vector<8x128xf32> to vector<1x8x128xf32>
    tpu.vector_store %arg4[%c0_6, %c0_7, %c0_8], %10 {strides = array<i32>} : memref<1x8x128xf32, #tpu.memory_space<vmem>>, vector<1x8x128xf32>,
    return
  }
  func.func @transform_0(%arg0: i32) -> (i32, i32, i32) {
    %c0_i32 = arith.constant 0 : i32
    %c0_i32_0 = arith.constant 0 : i32
    %c0_i32_1 = arith.constant 0 : i32
    return %arg0, %c0_i32, %c0_i32_0 : i32, i32, i32
  }
  func.func @transform_1(%arg0: i32) -> (i32, i32) {
    %c0_i32 = arith.constant 0 : i32
    %c0_i32_0 = arith.constant 0 : i32
    %c0_i32_1 = arith.constant 0 : i32
    return %c0_i32, %c0_i32_0 : i32, i32
  }
  func.func @transform_2(%arg0: i32) -> (i32, i32) {
    %c0_i32 = arith.constant 0 : i32
    %c0_i32_0 = arith.constant 0 : i32
    %c0_i32_1 = arith.constant 0 : i32
    return %c0_i32, %c0_i32_0 : i32, i32
  }
  func.func @transform_3(%arg0: i32) -> (i32, i32, i32) {
    %c0_i32 = arith.constant 0 : i32
    %c0_i32_0 = arith.constant 0 : i32
    %c0_i32_1 = arith.constant 0 : i32
    return %arg0, %c0_i32, %c0_i32_0 : i32, i32, i32
  }
}

</mosaic_0001>

<bundles_post_ra>
// kernel: _lambda_.25
= control target key start
LH: loop header
LB: loop body
LE: loop exit
PB: predicated region body
PF: predicated region fallthrough
CT: control target
= control target key end

     0   :  { %8 = vsyncpa [#allocation3], 0  ;;  %s574_s0 = inlined_call_operand.vmem [shape: f32[2,8,32], index: 0, kind: input, shape index: {}]   ;;  %s575_s1 = inlined_call_operand.vmem [shape: bf16[32,128], index: 1, kind: input, shape index: {}]   ;;  %s576_s2 = inlined_call_operand.vmem [shape: f32[1,128], index: 2, kind: input, shape index: {}]   ;;  %s577_s3 = inlined_call_operand.hbm [shape: f32[2,8,128], index: 3, kind: output, shape index: {}]  }
   0x1   :  { %10 = vsyncpa [#allocation3 + $0x1], 0  ;;  %s465_s12 = smov 0   ;;  %s467_s13 = smov 0  }
   0x2   :  { %s469_s14 = smov 0   ;;  %s471_s15 = smov 0  }
   0x3 LB: > { %s486_s16 = sadd.s32 4294967295, %s440_s15   ;;  %s310_s17 = sadd.s32 4294967294, %s440_s15   ;;  %s440_s15 = sphi %s471_s15, %s583_s15   ;;  %s436_s14 = sphi %s469_s14, %s582_s14   ;;  %s432_s13 = sphi %s467_s13, %s581_s13   ;;  %s428_s12 = sphi %s465_s12, %s580_s12  }
   0x4   : > { %s490_s18 = sadd.s32 1, %s440_s15   ;;  %s91_s19 = sadd.s32 1, %s436_s14 }
   0x5   : > { %s88_s20 = ssub.s32 %s440_s15, %s490_s18  ;;  %p101_p0 = scmp.ne.s32.totalorder %s436_s14, %s432_s13 }
   0x6   : > { %p89_p1 = scmp.eq.s32.totalorder %s88_s20, 0  ;;  %p102_p2 = scmp.eq.s32.totalorder %s486_s16, 1 }
   0x7   : > { %p107_p3 = scmp.ne.s32.totalorder %s432_s13, %s428_s12  ;;  %p108_p4 = scmp.eq.s32.totalorder %s310_s17, 1 }
   0x8   : > { %s501_s21 = scalar_select %p89_p1, %s436_s14, %s91_s19  }
   0x9   : > { %p503_p5 = por %p102_p2, %p101_p0  ;;  %p507_p6 = por %p108_p4, %p107_p3 }
   0xa   : > { %p313_p7 = scmp.ge.s32.totalorder %s440_s15, 1  ;;  %p139_p8 = scmp.lt.s32.totalorder %s440_s15, 3 }
   0xc   : > { %p140_p9 = pnand %p313_p7, %p139_p8 }
   0xd   : > { %v376_v0 = vld [vmem:[%s575_s1] sm:$0xff] (!%p140_p9)   ;;  %v442_v1 = vmov (!%p140_p9), 0.0   ;;  %v377_v2 = vld [vmem:[%s575_s1 + $0x8] sm:$0xff] (!%p140_p9)   ;;  %vm443_vm0 = vmmov (!%p140_p9), 0   ;;  %p162_p10 = scmp.lt.s32.totalorder (!%p140_p9), %s486_s16, 1  ;;  %vm192_vm1 = vcmask (!%p140_p9), 261120  }
   0xe   : > { %143 = sbr.rel (%p140_p9) target bundleno = 256 (0x100), region = 32  ;;  %327 = vmatprep.subr.bf16.mxu0 (!%p140_p9), %v442_v1  ;;  %331 = vmatprep.mubr.msk.bf16.mxu0 (!%p140_p9), %vm443_vm0, %v442_v1  ;;  %s159_s6 = sand.u32 (!%p140_p9), 1, %s432_s13   ;;  %v316_v5 = vld [vmem:[%s576_s2] ss:$0 sm:$0xff] (!%p140_p9) }
   0xf   : > { %328 = vmatpush3.bf16.msra.mxu0 (!%p140_p9), %v376_v0  ;;  %s314_s7 = sshll.u32 (!%p140_p9), %s159_s6, 3  ;;  %s321_s10 = sshll.u32 (!%p140_p9), %s486_s16, 7 }
  0x10   : > { %329 = vmatprep.subr.bf16.mxu0 (!%p140_p9), %v442_v1  ;;  %s161_s11 = scalar_lea.vmem (!%p140_p9), [#allocation2], %s314_s7  ;;  %s532_s24 = scalar_lea.hbm (!%p140_p9), %s577_s3, %s321_s10 }
  0x11   : > { %s251_s17 = sshll.u32 (!%p140_p9), %s161_s11, 4  ;;  %s238_s25 = scalar_lea.sflag (!%p140_p9), [#allocation3], %s159_s6  ;;  %s534_s17 = int_to_ptr.vmem [resolvable:$true] %s251_s17 }
  0x12   : > { %s444_s26 = smov (!%p140_p9), [#allocation2]  }
  0x13   : > { %330 = vmatpush3.bf16.msra.mxu0 (!%p140_p9), %v377_v2  ;;  %s382_s27 = sshll.u32 (!%p140_p9), %s444_s26, 4  ;;  %s383_s27 = int_to_ptr.vmem [resolvable:$false] %s382_s27 }
  0x14   : > { %p385_p0 = scmp.lt.s32.totalorder (!%p140_p9), %s534_s17, %s383_s27 }
  0x15   : > { %s163_s28 = scalar_select %p162_p10, %s486_s16, 1 }
  0x16   : > { %s378_s16 = scalar_lea.vmem %s534_s17, 128 }
  0x17   : > { %s315_s29 = sshll.u32 %s163_s28, 3  ;;  %p379_p11 = scmp.ne.s32.totalorder %s534_s17, %s378_s16 }
  0x18   : > { %s165_s5 = scalar_lea.vmem %s574_s0, %s315_s29  ;;  %s384_s28 = scalar_lea.vmem %s383_s27, 256 }
  0x19   : > { %v167_v3 = vld [vmem:[%s165_s5] sm:$0xff]  ;;  %p380_p12 = pnand %p379_p11, %p503_p5  ;;  %p386_p1 = scmp.lt.s32.totalorder %s384_s28, %s378_s16 }
  0x1a   : > { %v168_v4 = vpack.c.bf16 %v167_v3, %v167_v3 }
  0x1b   : > { %p381_p13 = pneg %p380_p12  ;;  %p387_p2 = por %p386_p1, %p385_p0 }
  0x1c   : > { %332 = vmatmul.mubr.msk.bf16.vlgmr.msra.gmra.mrb[0].mxu0 %vm192_vm1, %v168_v4 }
  0x1d   : > { %p388_p3 = pnand %p387_p2, %p381_p13 }
  0xef   : > { %v230_v6 = vpop.f32.mrb[0].mxu0 }
  0xf0   : > { %v231_v7 = vadd.f32 %v316_v5, %v230_v6  ;;  %v333_v8 = vpop.f32.mrb[1].mxu0 }
  0xf1   : > { %v233_v9 = vpop.f32.mrb[2].mxu0 }
  0xf2   : > { %236 = vst [vmem:[%s161_s11] sm:$0xff] %v231_v7  ;;  %v334_v10 = vpop.f32.mrb[3].mxu0 }
  0xf3   : > { %391 = shalt.err (!%p388_p3)
}
  0xf4   : > { %s392_s29 = scalar_lea.hbm %s532_s24, 128  ;;  %s396_s5 = scalar_lea.hbm %s577_s3, 256 }
  0xf5   : > { %p393_p4 = scmp.ne.s32.totalorder %s532_s24, %s392_s29  ;;  %p397_p9 = scmp.lt.u32.totalorder %s532_s24, %s577_s3 }
  0xf6   : > { %p398_p10 = scmp.lt.u32.totalorder %s396_s5, %s392_s29  ;;  %p400_p12 = scmp.lt.u32.totalorder %s392_s29, %s532_s24 }
  0xf7   : > { %p394_p7 = pnand %p393_p4, %p503_p5 }
  0xf8   : > { %p399_p11 = por %p398_p10, %p397_p9 }
  0xf9   : > { %p395_p8 = pneg %p394_p7 }
  0xfa   : > { %p401_p13 = por %p400_p12, %p399_p11 }
  0xfc   : > { %p402_p0 = pnand %p401_p13, %p395_p8 }
  0xfe   : > { %405 = shalt.err (!%p402_p0)
}
  0xff   : > { %335 = dma.vmem_to_hbm [thread:$0]  (%p503_p5), %s534_s17, 128, %s532_s24, %s238_s25  }
 0x100 PF: > { %p341_p1 = scmp.ge.s32.totalorder %s440_s15, 2  ;;  %s263_s8 = sand.u32 1, %s428_s12  }
 0x101   : > { %s264_s9 = scalar_lea.sflag [#allocation3], %s263_s8 }
 0x102   : > { %p338_p2 = pnand %p341_p1, %p507_p6 }
 0x104   : > { %423 = dma.done.wait (!%p338_p2), %s264_s9, 128  }
 0x105   : > { %425 = vsyncadd (!%p338_p2), %s264_s9, 4294967168  ;;  %p13_p3 = scmp.ge.s32.totalorder %s490_s18, 4   ;;  %s580_s12 = smov %s432_s13 }
 0x106   : > { %s581_s13 = smov %s436_s14  ;;  %s582_s14 = smov %s501_s21 }
 0x107   : > { %s583_s15 = smov %s490_s18  ;;  %15 = sbr.rel (!%p13_p3) target bundleno = 3 (0x3), region = 67 }
 0x10e   :  { %269 = vsyncpa [#allocation3], 1 }
 0x10f   :  { %271 = vsyncpa [#allocation3 + $0x1], 1 }

// kernel: _lambda_.17
= control target key start
LH: loop header
LB: loop body
LE: loop exit
PB: predicated region body
PF: predicated region fallthrough
CT: control target
= control target key end

     0   :  { %s301_s12 = smov 0   ;;  %s327_s0 = inlined_call_operand.vmem [shape: f32[2,8,32], index: 0, kind: input, shape index: {}]   ;;  %s328_s1 = inlined_call_operand.vmem [shape: f32[1,32], index: 1, kind: input, shape index: {}]   ;;  %s329_s2 = inlined_call_operand.vmem [shape: f32[1,32], index: 2, kind: input, shape index: {}]   ;;  %s330_s3 = inlined_call_operand.vmem [shape: f32[2,8,32], index: 3, kind: output, shape index: {}]  }
   0x1 LB: > { %s252_s13 = sadd.s32 4294967295, %s279_s12   ;;  %p256_p0 = scmp.ge.s32.totalorder %s279_s12, 1  ;;  %s279_s12 = sphi %s301_s12, %s13_s12  }
   0x2   : > { %p136_p1 = scmp.lt.s32.totalorder %s279_s12, 3 }
   0x4   : > { %p137_p2 = pnand %p256_p0, %p136_p1 }
   0x5   : > { %p158_p3 = scmp.lt.s32.totalorder (!%p137_p2), %s252_s13, 1  ;;  %vm169_vm0 = vcmask (!%p137_p2), 261120   ;;  %v259_v11 = vld [vmem:[%s328_s1] ss:$0 sm:$0xff] (!%p137_p2) }
   0x6   : > { %140 = sbr.rel (%p137_p2) target bundleno = 331 (0x14b), region = 32  ;;  %v260_v13 = vld [vmem:[%s329_s2] ss:$0 sm:$0xff] (!%p137_p2) }
   0xd   : > { %s332_s13 = smov (!%p158_p3, %s252_s13), 1 }
   0xe   : > { %s257_s14 = sshll.u32 %s332_s13, 3 }
   0xf   : > { %s161_s17 = scalar_lea.vmem %s327_s0, %s257_s14  ;;  %s165_s24 = scalar_lea.vmem %s330_s3, %s257_s14 }
  0x10   : > { %v166_v0 = vld [vmem:[%s161_s17] sm:$0xff] }
  0x11   : > { %v170_v1 = vsel %vm169_vm0, %v166_v0, 0.0 }
  0x12   : > { %171 = vadd.xlane.f32.xlu0 %v170_v1 }
  0x9f   : > { %v172_v2 = vpop.xlane.xlu0 %171 }
  0xa0   : > { %v174_v3 = vmul.f32 0.03125, %v172_v2 }
  0xa2   : > { %v175_v4 = vsub.f32 %v166_v0, %v174_v3 }
  0xa4   : > { %v176_v5 = vmul.f32 %v175_v4, %v175_v4 }
  0xa6   : > { %v177_v6 = vsel %vm169_vm0, %v176_v5, 0.0 }
  0xa7   : > { %178 = vadd.xlane.f32.xlu0 %v177_v6 }
 0x134   : > { %v179_v7 = vpop.xlane.xlu0 %178 }
 0x135   : > { %v180_v8 = vmul.f32 0.03125, %v179_v7 }
 0x137   : > { %v181_v9 = vadd.f32 1e-05, %v180_v8 }
 0x139   : > { %271 = vrsqrt.f32 %v181_v9 }
 0x143   : > { %v272_v10 = vpop.eup %271 }
 0x144   : > { %v183_v12 = vmul.f32 %v272_v10, %v175_v4 }
 0x146   : > { %v190_v14 = vmul.f32 %v259_v11, %v183_v12 }
 0x148   : > { %v197_v15 = vadd.f32 %v260_v13, %v190_v14 }
 0x14a   : > { %198 = vst.msk [vmem:[%s165_s24] sm:$0xff] %vm169_vm0, %v197_v15 }
 0x14b PF: > { %s13_s12 = sadd.s32 1, %s279_s12  }
 0x14c   : > { %p10_p4 = scmp.ge.s32.totalorder %s13_s12, 4  }
 0x14e   :  { %12 = sbr.rel (!%p10_p4) target bundleno = 1 (0x1), region = 62 }

// kernel: _lambda_.14
= control target key start
LH: loop header
LB: loop body
LE: loop exit
PB: predicated region body
PF: predicated region fallthrough
CT: control target
= control target key end

     0   :  { %s631_s24 = smov 0   ;;  %s689_s0 = inlined_call_operand.vmem [shape: f32[2,8,32], index: 0, kind: input, shape index: {}]   ;;  %s690_s1 = inlined_call_operand.vmem [shape: bf16[32,64], index: 1, kind: input, shape index: {}]   ;;  %s691_s2 = inlined_call_operand.vmem [shape: f32[1,64], index: 2, kind: input, shape index: {}]   ;;  %s692_s3 = inlined_call_operand.vmem [shape: bf16[64,32], index: 3, kind: input, shape index: {}]   ;;  %s693_s4 = inlined_call_operand.vmem [shape: f32[1,32], index: 4, kind: input, shape index: {}]   ;;  %s694_s5 = inlined_call_operand.vmem [shape: f32[1,32], index: 5, kind: input, shape index: {}]   ;;  %s695_s6 = inlined_call_operand.vmem [shape: f32[1,32], index: 6, kind: input, shape index: {}]   ;;  %s696_s7 = inlined_call_operand.vmem [shape: f32[2,8,32], index: 7, kind: output, shape index: {}]  }
   0x1 LB: > { %s514_s25 = sadd.s32 4294967295, %s587_s24   ;;  %p518_p0 = scmp.ge.s32.totalorder %s587_s24, 1  ;;  %s587_s24 = sphi %s631_s24, %s17_s24  }
   0x2   : > { %p236_p1 = scmp.lt.s32.totalorder %s587_s24, 3 }
   0x4   : > { %p237_p2 = pnand %p518_p0, %p236_p1 }
   0x5   : > { %v573_v0 = vld [vmem:[%s690_s1] sm:$0xff] (!%p237_p2)   ;;  %v589_v1 = vmov (!%p237_p2), 0.0   ;;  %v574_v2 = vld [vmem:[%s690_s1 + $0x8] sm:$0xff] (!%p237_p2)   ;;  %vm590_vm0 = vmmov (!%p237_p2), 0   ;;  %p266_p3 = scmp.lt.s32.totalorder (!%p237_p2), %s514_s25, 1  ;;  %vm300_vm1 = vcmask (!%p237_p2), 261120  }
   0x6   : > { %240 = sbr.rel (%p237_p2) target bundleno = 767 (0x2ff), region = 48  ;;  %543 = vmatprep.subr.bf16.mxu0 (!%p237_p2), %v589_v1  ;;  %551 = vmatprep.subr.bf16.mxu1 (!%p237_p2), %v589_v1  ;;  %v575_v3 = vld [vmem:[%s692_s3] sm:$0xff] (!%p237_p2)   ;;  %v576_v4 = vld [vmem:[%s692_s3 + $0x8] sm:$0xff] (!%p237_p2)   ;;  %v577_v7 = vld [vmem:[%s692_s3 + $0x10] sm:$0xff] (!%p237_p2)   ;;  %vm385_vm2 = vcmask (!%p237_p2), 523264  }
   0x7   : > { %544 = vmatpush3.bf16.msra.mxu0 (!%p237_p2), %v573_v0  ;;  %547 = vmatprep.mubr.msk.bf16.mxu0 (!%p237_p2), %vm590_vm0, %v589_v1  ;;  %v578_v8 = vld [vmem:[%s692_s3 + $0x18] sm:$0xff] (!%p237_p2)   ;;  %v521_v9 = vld [vmem:[%s691_s2] ss:$0 sm:$0xff] (!%p237_p2) }
   0x8   : > { %545 = vmatprep.subr.bf16.mxu0 (!%p237_p2), %v589_v1  ;;  %559 = vmatprep.mubr.msk.bf16.mxu1 (!%p237_p2), %vm590_vm0, %v589_v1  ;;  %v525_v17 = vld [vmem:[%s693_s4] ss:$0 sm:$0xff] (!%p237_p2) }
   0x9   : > { %552 = vmatpush3.bf16.msra.mxu1 (!%p237_p2), %v575_v3  ;;  %v531_v34 = vld [vmem:[%s694_s5] ss:$0 sm:$0xff] (!%p237_p2) }
   0xa   : > { %553 = vmatprep.subr.bf16.mxu1 (!%p237_p2), %v589_v1  ;;  %v532_v36 = vld [vmem:[%s695_s6] ss:$0 sm:$0xff] (!%p237_p2) }
   0xb   : > { %546 = vmatpush3.bf16.msra.mxu0 (!%p237_p2), %v574_v2 }
   0xd   : > { %s698_s25 = smov (!%p266_p3, %s514_s25), 1  ;;  %554 = vmatpush3.bf16.msra.mxu1 %v576_v4 }
   0xe   : > { %s519_s11 = sshll.u32 %s698_s25, 3  ;;  %555 = vmatprep.subr.bf16.mxu1 %v589_v1 }
   0xf   : > { %s269_s14 = scalar_lea.vmem %s689_s0, %s519_s11  ;;  %s273_s8 = scalar_lea.vmem %s696_s7, %s519_s11 }
  0x10   : > { %v275_v5 = vld [vmem:[%s269_s14] sm:$0xff] }
  0x11   : > { %v276_v6 = vpack.c.bf16 %v275_v5, %v275_v5  ;;  %556 = vmatpush3.bf16.msra.mxu1 %v577_v7 }
  0x12   : > { %557 = vmatprep.subr.bf16.mxu1 %v589_v1 }
  0x13   : > { %548 = vmatmul.mubr.msk.bf16.vlgmr.msra.gmra.mrb[0].mxu0 %vm300_vm1, %v276_v6 }
  0x15   : > { %558 = vmatpush3.bf16.msra.mxu1 %v578_v8 }
  0xe6   : > { %v338_v10 = vpop.f32.mrb[0].mxu0 }
  0xe7   : > { %v339_v11 = vadd.f32 %v521_v9, %v338_v10  ;;  %v549_v12 = vpop.f32.mrb[1].mxu0 }
  0xe8   : > { %v341_v13 = vpop.f32.mrb[2].mxu0 }
  0xe9   : > { %v344_v14 = vmax.f32 %v339_v11, 0.0  ;;  %v550_v15 = vpop.f32.mrb[3].mxu0 }
  0xeb   : > { %v345_v16 = vpack.c.bf16 %v344_v14, %v344_v14 }
  0xed   : > { %560 = vmatmul.mubr.msk.bf16.vlgmr.msra.gmra.mrb[0].mxu1 %vm385_vm2, %v345_v16 }
 0x1c0   : > { %v423_v18 = vpop.f32.mrb[0].mxu1 }
 0x1c1   : > { %v424_v19 = vadd.f32 %v525_v17, %v423_v18  ;;  %v561_v20 = vpop.f32.mrb[1].mxu1 }
 0x1c2   : > { %v426_v21 = vpop.f32.mrb[2].mxu1 }
 0x1c3   : > { %v562_v22 = vpop.f32.mrb[3].mxu1  ;;  %v429_v23 = vadd.f32 %v424_v19, %v275_v5 }
 0x1c5   : > { %v432_v24 = vsel %vm300_vm1, %v429_v23, 0.0 }
 0x1c6   : > { %433 = vadd.xlane.f32.xlu0 %v432_v24 }
 0x253   : > { %v434_v25 = vpop.xlane.xlu0 %433 }
 0x254   : > { %v436_v26 = vmul.f32 0.03125, %v434_v25 }
 0x256   : > { %v437_v27 = vsub.f32 %v429_v23, %v436_v26 }
 0x258   : > { %v438_v28 = vmul.f32 %v437_v27, %v437_v27 }
 0x25a   : > { %v439_v29 = vsel %vm300_vm1, %v438_v28, 0.0 }
 0x25b   : > { %440 = vadd.xlane.f32.xlu0 %v439_v29 }
 0x2e8   : > { %v441_v30 = vpop.xlane.xlu0 %440 }
 0x2e9   : > { %v442_v31 = vmul.f32 0.03125, %v441_v30 }
 0x2eb   : > { %v443_v32 = vadd.f32 1e-05, %v442_v31 }
 0x2ed   : > { %579 = vrsqrt.f32 %v443_v32 }
 0x2f7   : > { %v580_v33 = vpop.eup %579 }
 0x2f8   : > { %v445_v35 = vmul.f32 %v580_v33, %v437_v27 }
 0x2fa   : > { %v452_v37 = vmul.f32 %v531_v34, %v445_v35 }
 0x2fc   : > { %v459_v38 = vadd.f32 %v532_v36, %v452_v37 }
 0x2fe   : > { %460 = vst.msk [vmem:[%s273_s8] sm:$0xff] %vm300_vm1, %v459_v38 }
 0x2ff PF: > { %s17_s24 = sadd.s32 1, %s587_s24  }
 0x300   : > { %p14_p4 = scmp.ge.s32.totalorder %s17_s24, 4  }
 0x302   :  { %16 = sbr.rel (!%p14_p4) target bundleno = 1 (0x1), region = 78 }

// kernel: _lambda_.13
= control target key start
LH: loop header
LB: loop body
LE: loop exit
PB: predicated region body
PF: predicated region fallthrough
CT: control target
= control target key end

     0   :  { %s1798_s17 = smov 0   ;;  %s1973_s0 = inlined_call_operand.vmem [shape: f32[2,8,32], index: 0, kind: input, shape index: {}, may-alias: {0,1}]   ;;  %s1974_s1 = inlined_call_operand.vmem [shape: f32[2,8,32], index: 1, kind: input, shape index: {}, may-alias: {0,1}]   ;;  %s1975_s2 = inlined_call_operand.vmem [shape: bf16[32,32], index: 2, kind: input, shape index: {}]   ;;  %s1976_s3 = inlined_call_operand.vmem [shape: f32[1,32], index: 3, kind: input, shape index: {}]   ;;  %s1977_s4 = inlined_call_operand.vmem [shape: bf16[32,64], index: 4, kind: input, shape index: {}]   ;;  %s1978_s5 = inlined_call_operand.vmem [shape: f32[1,64], index: 5, kind: input, shape index: {}]   ;;  %s1979_s6 = inlined_call_operand.vmem [shape: bf16[32,32], index: 6, kind: input, shape index: {}]   ;;  %s1980_s7 = inlined_call_operand.vmem [shape: f32[1,32], index: 7, kind: input, shape index: {}]   ;;  %s1981_s8 = inlined_call_operand.vmem [shape: f32[2,1,8,8], index: 8, kind: input, shape index: {}]   ;;  %s1982_s9 = inlined_call_operand.vmem [shape: f32[1,32], index: 9, kind: input, shape index: {}]   ;;  %s1983_s10 = inlined_call_operand.vmem [shape: f32[1,32], index: 10, kind: input, shape index: {}]   ;;  %s1984_s11 = inlined_call_operand.vmem [shape: f32[2,8,32], index: 11, kind: output, shape index: {}]  }
   0x1 LB: > { %s1534_s18 = sadd.s32 4294967295, %s1727_s17   ;;  %p1538_p0 = scmp.ge.s32.totalorder %s1727_s17, 1  ;;  %s1727_s17 = sphi %s1798_s17, %s21_s17  }
   0x2   : > { %p354_p1 = scmp.lt.s32.totalorder %s1727_s17, 3 }
   0x4   : > { %p355_p2 = pnand %p1538_p0, %p354_p1 }
   0x5   : > { %v1699_v0 = vld [vmem:[%s1977_s4] sm:$0xff] (!%p355_p2)   ;;  %v1729_v1 = vmov (!%p355_p2), 0.0   ;;  %v1701_v3 = vld [vmem:[%s1977_s4 + $0x8] sm:$0xff] (!%p355_p2)   ;;  %vm1730_vm0 = vmmov (!%p355_p2), 0   ;;  %p400_p3 = scmp.lt.s32.totalorder (!%p355_p2), %s1534_s18, 1  ;;  %vm443_vm1 = vcmask (!%p355_p2), 261120  }
   0x6   : > { %358 = sbr.rel (%p355_p2) target bundleno = 2914 (0xb62), region = 64  ;;  %1610 = vmatprep.subr.bf16.mxu1 (!%p355_p2), %v1729_v1  ;;  %1602 = vmatprep.subr.bf16.mxu0 (!%p355_p2), %v1729_v1  ;;  %v1700_v2 = vld [vmem:[%s1975_s2] sm:$0xff] (!%p355_p2)   ;;  %v1702_v4 = vld [vmem:[%s1975_s2 + $0x8] sm:$0xff] (!%p355_p2)   ;;  %vm555_vm2 = vcmask (!%p355_p2), 64512   ;;  %s1731_s20 = smov (!%p355_p2), 120   ;;  %vm895_vm3 = vcmask (!%p355_p2), 1043456  }
   0x7   : > { %1611 = vmatpush3.bf16.msra.mxu1 (!%p355_p2), %v1699_v0  ;;  %1614 = vmatprep.mubr.msk.bf16.mxu1 (!%p355_p2), %vm1730_vm0, %v1729_v1  ;;  %v1547_v9 = vld [vmem:[%s1978_s5] ss:$0 sm:$0xff] (!%p355_p2)  ;;  %s1732_s24 = smov (!%p355_p2), 96   ;;  %s1733_s25 = smov (!%p355_p2), 88   ;;  %v891_v48 = vld [vmem:[%s1979_s6 + $0x4] sm:$0xf] (!%p355_p2) }
   0x8   : > { %1603 = vmatpush3.bf16.msra.mxu0 (!%p355_p2), %v1700_v2  ;;  %1612 = vmatprep.subr.bf16.mxu1 (!%p355_p2), %v1729_v1  ;;  %v1543_v10 = vld [vmem:[%s1976_s3] ss:$0 sm:$0xff] (!%p355_p2)  ;;  %s1734_s26 = smov (!%p355_p2), 112   ;;  %v897_v49 = vsel (!%p355_p2), %vm895_vm3, %v891_v48, 0  ;;  %s1735_s13 = smov (!%p355_p2), 80  }
   0x9   : > { %1604 = vmatprep.subr.bf16.mxu0 (!%p355_p2), %v1729_v1  ;;  %1606 = vmatprep.mubr.msk.bf16.mxu0 (!%p355_p2), %vm1730_vm0, %v1729_v1  ;;  %v722_v52 = vld [vmem:[%s1979_s6] sm:$0xf] (!%p355_p2) }
   0xa   : > { %v943_v55 = vsel (!%p355_p2), %vm895_vm3, %v722_v52, 0 }
   0xb   : > { %1613 = vmatpush3.bf16.msra.mxu1 (!%p355_p2), %v1701_v3 }
   0xc   : > { %1605 = vmatpush3.bf16.msra.mxu0 (!%p355_p2), %v1702_v4  ;;  %1618 = vmatprep.subr.mxu1 (!%p355_p2), %v1729_v1 }
   0xd   : > { %s1986_s18 = smov (!%p400_p3, %s1534_s18), 1  ;;  %1628 = vmatprep.subr.mxu0 %v1729_v1 }
   0xe   : > { %s1826_s27 = sshll.u32 %s1986_s18, 3  ;;  %s1737_s18 = smov 72  }
   0xf   : > { %s407_s30 = scalar_lea.vmem %s1974_s1, %s1826_s27  ;;  %s403_s14 = scalar_lea.vmem %s1973_s0, %s1826_s27 }
  0x10   : > { %v418_v5 = vld [vmem:[%s407_s30] sm:$0xff]  ;;  %s411_s23 = scalar_lea.vmem %s1981_s8, %s1826_s27  ;;  %s415_s30 = scalar_lea.vmem %s1984_s11, %s1826_s27 }
  0x11   : > { %v487_v6 = vpack.c.bf16 %v418_v5, %v418_v5  ;;  %v1838_v7 = vld [vmem:[%s403_s14] sm:$0xff]  ;;  %s1736_s14 = smov 104  }
  0x12   : > { %v419_v8 = vpack.c.bf16 %v1838_v7, %v1838_v7  ;;  %v1876_v24 = vld [vmem:[%s411_s23] sm:$0xff] }
  0x13   : > { %1615 = vmatmul.mubr.msk.bf16.vlgmr.msra.gmra.mrb[0].mxu1 %vm443_vm1, %v487_v6 }
  0x14   : > { %1607 = vmatmul.mubr.msk.bf16.vlgmr.msra.gmra.mrb[0].mxu0 %vm443_vm1, %v419_v8  ;;  %1620 = vmatprep.mubr.msk.f32.mxu1 %vm1730_vm0, %v1729_v1 }
  0x15   : > { %1630 = vmatprep.mubr.msk.f32.mxu0 %vm1730_vm0, %v1729_v1 }
  0xe6   : > { %v548_v11 = vpop.f32.mrb[0].mxu1 }
  0xe7   : > { %v1854_v12 = vadd.f32 %v1547_v9, %v548_v11  ;;  %v1616_v13 = vpop.f32.mrb[1].mxu1  ;;  %v481_v14 = vpop.f32.mrb[0].mxu0 }
  0xe8   : > { %v551_v15 = vpop.f32.mrb[2].mxu1  ;;  %v1856_v16 = vadd.f32 %v1543_v10, %v481_v14  ;;  %v1608_v17 = vpop.f32.mrb[1].mxu0 }
  0xe9   : > { %725 = vrot.lane.b32.xlu0 %v1854_v12, %s1731_s20  ;;  %v1617_v18 = vpop.f32.mrb[3].mxu1  ;;  %1619 = vmatpush3.xpose.msk.msra.mxu1 %vm555_vm2, %v1854_v12  ;;  %v484_v19 = vpop.f32.mrb[2].mxu0 }
  0xea   : > { %v1609_v20 = vpop.f32.mrb[3].mxu0  ;;  %1623 = vmatprep.subr.mxu1 %v1729_v1 }
  0xec   : > { %1621 = vmatmul.mubr.msk.f32.vlgmr.msra.gmra.mrb[4].mxu1 %vm555_vm2, %v1856_v16 }
  0xed   : > { %723 = vrot.lane.b32.xlu0 %v1856_v16, %s1731_s20  ;;  %1625 = vmatprep.mubr.msk.f32.mxu1 %vm1730_vm0, %v1729_v1 }
 0x15b   : > { %v726_v21 = vpop.permute.xlu0 %725 }
 0x15c   : > { %1629 = vmatpush3.xpose.msk.msra.mxu0 %vm555_vm2, %v726_v21 }
 0x15d   : > { %1638 = vmatprep.subr.bf16.mxu0 %v1729_v1 }
 0x15f   : > { %v724_v22 = vpop.permute.xlu0 %723 }
 0x160   : > { %1631 = vmatmul.mubr.msk.f32.vlgmr.msra.gmra.mrb[4].mxu0 %vm555_vm2, %v724_v22 }
 0x161   : > { %1640 = vmatprep.mubr.msk.bf16.mxu0 %vm1730_vm0, %v1729_v1  ;;  %1639 = vmatpush3.bf16.msra.mxu0 %v897_v49 }
 0x162   : > { %1650 = vmatprep.subr.mxu0 %v1729_v1 }
 0x1bf   : > { %v628_v23 = vpop.f32.mrb[4].mxu1 }
 0x1c0   : > { %v632_v25 = vmul.f32 0.35355338, %v628_v23  ;;  %v1622_v26 = vpop.f32.mrb[5].mxu1 }
 0x1c2   : > { %v633_v27 = vadd.f32 %v632_v25, %v1876_v24 }
 0x1c4   : > { %v634_v28 = vsel %vm555_vm2, %v633_v27, -inf }
 0x1c5   : > { %635 = vmax.xlane.f32.xlu1 %v634_v28 }
 0x233   : > { %v797_v29 = vpop.f32.mrb[4].mxu0 }
 0x234   : > { %v801_v30 = vmul.f32 0.35355338, %v797_v29  ;;  %v1632_v31 = vpop.f32.mrb[5].mxu0  ;;  %v1153_v29 = vld [vmem:[%s1979_s6 + $0x8] sm:$0xf] }
 0x236   : > { %v802_v32 = vadd.f32 %v801_v30, %v1876_v24  ;;  %v1158_v30 = vsel %vm895_vm3, %v1153_v29, 0 }
 0x238   : > { %v803_v33 = vsel %vm555_vm2, %v802_v32, -inf }
 0x239   : > { %804 = vmax.xlane.f32.xlu1 %v803_v33 }
 0x24a   : > { %645 = vrot.lane.b32.xlu1 %v1854_v12, %s1732_s24 }
 0x252   : > { %v636_v34 = vpop.xlane.xlu1 %635 }
 0x253   : > { %v637_v35 = vsub.f32 %v633_v27, %v636_v34 }
 0x255   : > { %v638_v36 = vmul.f32 1.442695, %v637_v35 }
 0x257   : > { %1703 = vpow2.f32 %v638_v36 }
 0x261   : > { %v1704_v37 = vpop.eup %1703 }
 0x262   : > { %v640_v38 = vsel %vm555_vm2, %v1704_v37, 0.0 }
 0x263   : > { %641 = vadd.xlane.f32.xlu0 %v640_v38 }
 0x2c6   : > { %v805_v39 = vpop.xlane.xlu1 %804 }
 0x2c7   : > { %v806_v40 = vsub.f32 %v802_v32, %v805_v39 }
 0x2c9   : > { %v807_v41 = vmul.f32 1.442695, %v806_v40 }
 0x2ca   : > { %v646_v42 = vpop.permute.xlu1 %645 }
 0x2cb   : > { %1705 = vpow2.f32 %v807_v41  ;;  %1624 = vmatpush3.msra.mxu1 %v646_v42 }
 0x2cc   : > { %1633 = vmatprep.subr.mxu1 %v1729_v1 }
 0x2d5   : > { %v1706_v43 = vpop.eup %1705 }
 0x2d6   : > { %v809_v44 = vsel %vm555_vm2, %v1706_v43, 0.0 }
 0x2d7   : > { %810 = vadd.xlane.f32.xlu1 %v809_v44 }
 0x2e8   : > { %814 = vrot.lane.b32.xlu1 %v1854_v12, %s1733_s25 }
 0x2ec   : > { %987 = vrot.lane.b32.xlu1 %v1854_v12, %s1734_s26 }
 0x2f0   : > { %v642_v45 = vpop.xlane.xlu0 %641  ;;  %985 = vrot.lane.b32.xlu1 %v1856_v16, %s1734_s26 }
 0x2f1   : > { %1707 = vrcp.f32 %v642_v45 }
 0x2fb   : > { %v1708_v46 = vpop.eup %1707 }
 0x2fc   : > { %v644_v47 = vmul.f32 %v1708_v46, %v1704_v37 }
 0x2fe   : > { %1626 = vmatmul.mubr.msk.f32.vlgmr.msra.gmra.mrb[6].mxu1 %vm555_vm2, %v644_v47 }
 0x2ff   : > { %1635 = vmatprep.mubr.msk.f32.mxu1 %vm1730_vm0, %v1729_v1 }
 0x364   : > { %v811_v50 = vpop.xlane.xlu1 %810 }
 0x365   : > { %1709 = vrcp.f32 %v811_v50 }
 0x368   : > { %v815_v51 = vpop.permute.xlu1 %814 }
 0x369   : > { %1634 = vmatpush3.msra.mxu1 %v815_v51 }
 0x36a   : > { %1644 = vmatprep.subr.bf16.mxu1 %v1729_v1 }
 0x36c   : > { %v988_v62 = vpop.permute.xlu1 %987 }
 0x36f   : > { %v1710_v53 = vpop.eup %1709 }
 0x370   : > { %v813_v54 = vmul.f32 %v1710_v53, %v1706_v43  ;;  %v986_v63 = vpop.permute.xlu1 %985 }
 0x372   : > { %1636 = vmatmul.mubr.msk.f32.vlgmr.msra.gmra.mrb[8].mxu1 %vm555_vm2, %v813_v54 }
 0x373   : > { %1645 = vmatpush3.bf16.msra.mxu1 %v943_v55  ;;  %1646 = vmatprep.mubr.msk.bf16.mxu1 %vm1730_vm0, %v1729_v1 }
 0x374   : > { %1655 = vmatprep.subr.mxu1 %v1729_v1 }
 0x3d1   : > { %v717_v56 = vpop.f32.mrb[6].mxu1 }
 0x3d2   : > { %v721_v57 = vpack.c.bf16 %v717_v56, %v717_v56  ;;  %v1627_v58 = vpop.f32.mrb[7].mxu1  ;;  %v1567_v56 = vld [vmem:[%s1980_s7] ss:$0 sm:$0xff] }
 0x3d4   : > { %1647 = vmatmul.mubr.msk.bf16.vlgmr.msra.gmra.mrb[12].mxu1 %vm555_vm2, %v721_v57 }
 0x3d5   : > { %1657 = vmatprep.mubr.msk.f32.mxu1 %vm1730_vm0, %v1729_v1 }
 0x445   : > { %v886_v59 = vpop.f32.mrb[8].mxu1 }
 0x446   : > { %v890_v60 = vpack.c.bf16 %v886_v59, %v886_v59  ;;  %v1637_v61 = vpop.f32.mrb[9].mxu1 }
 0x448   : > { %1641 = vmatmul.mubr.msk.bf16.vlgmr.msra.gmra.mrb[8].mxu0 %vm555_vm2, %v890_v60 }
 0x449   : > { %1651 = vmatpush3.xpose.msk.msra.mxu0 %vm555_vm2, %v988_v62  ;;  %1652 = vmatprep.mubr.msk.f32.mxu0 %vm1730_vm0, %v1729_v1 }
 0x44a   : > { %1660 = vmatprep.subr.bf16.mxu0 %v1729_v1 }
 0x450   : > { %1653 = vmatmul.mubr.msk.f32.vlgmr.msra.gmra.mrb[6].mxu0 %vm555_vm2, %v986_v63 }
 0x451   : > { %1662 = vmatprep.mubr.msk.bf16.mxu0 %vm1730_vm0, %v1729_v1  ;;  %1661 = vmatpush3.bf16.msra.mxu0 %v1158_v30 }
 0x452   : > { %1676 = vmatprep.subr.bf16.mxu0 %v1729_v1 }
 0x4a7   : > { %v979_v0 = vpop.f32.mrb[12].mxu1 }
 0x4a8   : > { %v1648_v2 = vpop.f32.mrb[13].mxu1 }
 0x4a9   : > { %v982_v3 = vpop.f32.mrb[14].mxu1 }
 0x4aa   : > { %v1649_v4 = vpop.f32.mrb[15].mxu1 }
 0x51b   : > { %v933_v5 = vpop.f32.mrb[8].mxu0 }
 0x51c   : > { %v1917_v6 = vadd.f32 %v979_v0, %v933_v5  ;;  %v1642_v8 = vpop.f32.mrb[9].mxu0 }
 0x51d   : > { %v936_v9 = vpop.f32.mrb[10].mxu0 }
 0x51e   : > { %v1643_v10 = vpop.f32.mrb[11].mxu0 }
 0x523   : > { %v1059_v11 = vpop.f32.mrb[6].mxu0 }
 0x524   : > { %v1063_v13 = vmul.f32 0.35355338, %v1059_v11  ;;  %v1654_v14 = vpop.f32.mrb[7].mxu0 }
 0x526   : > { %v1064_v15 = vadd.f32 %v1063_v13, %v1876_v24  ;;  %v1569_v13 = vld [vmem:[%s1983_s10] ss:$0 sm:$0xff] }
 0x528   : > { %v1065_v17 = vsel %vm555_vm2, %v1064_v15, -inf }
 0x529   : > { %1066 = vmax.xlane.f32.xlu0 %v1065_v17 }
 0x53f   : > { %1076 = vrot.lane.b32.xlu0 %v1854_v12, %s1735_s13 }
 0x543   : > { %1203 = vrot.lane.b32.xlu0 %v1854_v12, %s1736_s14 }
 0x547   : > { %1201 = vrot.lane.b32.xlu0 %v1856_v16, %s1736_s14 }
 0x5b6   : > { %v1067_v18 = vpop.xlane.xlu0 %1066 }
 0x5b7   : > { %v1068_v19 = vsub.f32 %v1064_v15, %v1067_v18 }
 0x5b9   : > { %v1069_v20 = vmul.f32 1.442695, %v1068_v19 }
 0x5ba   : > { %v1077_v21 = vpop.permute.xlu0 %1076 }
 0x5bb   : > { %1711 = vpow2.f32 %v1069_v20  ;;  %1656 = vmatpush3.msra.mxu1 %v1077_v21 }
 0x5bc   : > { %1666 = vmatprep.subr.mxu1 %v1729_v1 }
 0x5be   : > { %v1204_v27 = vpop.permute.xlu0 %1203 }
 0x5c2   : > { %v1202_v16 = vpop.permute.xlu0 %1201 }
 0x5c5   : > { %v1712_v22 = vpop.eup %1711 }
 0x5c6   : > { %v1071_v23 = vsel %vm555_vm2, %v1712_v22, 0.0 }
 0x5c7   : > { %1072 = vadd.xlane.f32.xlu1 %v1071_v23 }
 0x654   : > { %v1073_v25 = vpop.xlane.xlu1 %1072 }
 0x655   : > { %1713 = vrcp.f32 %v1073_v25 }
 0x65f   : > { %v1714_v26 = vpop.eup %1713 }
 0x660   : > { %v1075_v28 = vmul.f32 %v1714_v26, %v1712_v22 }
 0x662   : > { %1658 = vmatmul.mubr.msk.f32.vlgmr.msra.gmra.mrb[10].mxu1 %vm555_vm2, %v1075_v28 }
 0x663   : > { %1667 = vmatpush3.xpose.msk.msra.mxu1 %vm555_vm2, %v1204_v27  ;;  %1668 = vmatprep.mubr.msk.f32.mxu1 %vm1730_vm0, %v1729_v1 }
 0x664   : > { %1671 = vmatprep.subr.mxu1 %v1729_v1 }
 0x666   : > { %1669 = vmatmul.mubr.msk.f32.vlgmr.msra.gmra.mrb[16].mxu1 %vm555_vm2, %v1202_v16 }
 0x667   : > { %1673 = vmatprep.mubr.msk.f32.mxu1 %vm1730_vm0, %v1729_v1 }
 0x735   : > { %v1148_v31 = vpop.f32.mrb[10].mxu1 }
 0x736   : > { %v1152_v32 = vpack.c.bf16 %v1148_v31, %v1148_v31  ;;  %v1659_v33 = vpop.f32.mrb[11].mxu1 }
 0x738   : > { %1663 = vmatmul.mubr.msk.bf16.vlgmr.msra.gmra.mrb[12].mxu0 %vm555_vm2, %v1152_v32 }
 0x739   : > { %v1275_v34 = vpop.f32.mrb[16].mxu1  ;;  %1678 = vmatprep.mubr.msk.bf16.mxu0 %vm1730_vm0, %v1729_v1  ;;  %v1369_v1 = vld [vmem:[%s1979_s6 + $0xc] sm:$0xf] }
 0x73a   : > { %v1279_v35 = vmul.f32 0.35355338, %v1275_v34  ;;  %v1670_v36 = vpop.f32.mrb[17].mxu1 }
 0x73c   : > { %v1280_v37 = vadd.f32 %v1279_v35, %v1876_v24  ;;  %v1374_v24 = vsel %vm895_vm3, %v1369_v1, 0 }
 0x73d   : > { %1677 = vmatpush3.bf16.msra.mxu0 %v1374_v24 }
 0x73e   : > { %v1281_v38 = vsel %vm555_vm2, %v1280_v37, -inf }
 0x73f   : > { %1282 = vmax.xlane.f32.xlu0 %v1281_v38 }
 0x7cc   : > { %v1283_v39 = vpop.xlane.xlu0 %1282 }
 0x7cd   : > { %v1284_v40 = vsub.f32 %v1280_v37, %v1283_v39 }
 0x7cf   : > { %v1285_v41 = vmul.f32 1.442695, %v1284_v40 }
 0x7d1   : > { %1715 = vpow2.f32 %v1285_v41 }
 0x7db   : > { %v1716_v42 = vpop.eup %1715 }
 0x7dc   : > { %v1287_v43 = vsel %vm555_vm2, %v1716_v42, 0.0 }
 0x7dd   : > { %1288 = vadd.xlane.f32.xlu1 %v1287_v43 }
 0x7ee   : > { %1292 = vrot.lane.b32.xlu1 %v1854_v12, %s1737_s18 }
 0x80b   : > { %v1194_v44 = vpop.f32.mrb[12].mxu0 }
 0x80c   : > { %v1200_v45 = vadd.f32 %v1194_v44, %v1917_v6  ;;  %v1664_v46 = vpop.f32.mrb[13].mxu0 }
 0x80d   : > { %v1197_v47 = vpop.f32.mrb[14].mxu0 }
 0x80e   : > { %v1665_v48 = vpop.f32.mrb[15].mxu0 }
 0x86a   : > { %v1289_v49 = vpop.xlane.xlu1 %1288 }
 0x86b   : > { %1717 = vrcp.f32 %v1289_v49 }
 0x86e   : > { %v1293_v50 = vpop.permute.xlu1 %1292 }
 0x86f   : > { %1672 = vmatpush3.msra.mxu1 %v1293_v50 }
 0x875   : > { %v1718_v51 = vpop.eup %1717 }
 0x876   : > { %v1291_v52 = vmul.f32 %v1718_v51, %v1716_v42 }
 0x878   : > { %1674 = vmatmul.mubr.msk.f32.vlgmr.msra.gmra.mrb[18].mxu1 %vm555_vm2, %v1291_v52 }
 0x94b   : > { %v1364_v12 = vpop.f32.mrb[18].mxu1 }
 0x94c   : > { %v1368_v53 = vpack.c.bf16 %v1364_v12, %v1364_v12  ;;  %v1675_v54 = vpop.f32.mrb[19].mxu1 }
 0x94e   : > { %1679 = vmatmul.mubr.msk.bf16.vlgmr.msra.gmra.mrb[16].mxu0 %vm555_vm2, %v1368_v53 }
 0xa21   : > { %v1410_v55 = vpop.f32.mrb[16].mxu0 }
 0xa22   : > { %v1416_v57 = vadd.f32 %v1410_v55, %v1200_v45  ;;  %v1680_v58 = vpop.f32.mrb[17].mxu0 }
 0xa23   : > { %v1413_v59 = vpop.f32.mrb[18].mxu0 }
 0xa24   : > { %v1424_v60 = vadd.f32 %v1567_v56, %v1416_v57  ;;  %v1681_v61 = vpop.f32.mrb[19].mxu0 }
 0xa26   : > { %v1425_v62 = vadd.f32 %v1424_v60, %v1838_v7  ;;  %v1568_v7 = vld [vmem:[%s1982_s9] ss:$0 sm:$0xff] }
 0xa28   : > { %v1428_v63 = vsel %vm443_vm1, %v1425_v62, 0.0 }
 0xa29   : > { %1429 = vadd.xlane.f32.xlu1 %v1428_v63 }
 0xab6   : > { %v1430_v0 = vpop.xlane.xlu1 %1429 }
 0xab7   : > { %v1432_v2 = vmul.f32 0.03125, %v1430_v0 }
 0xab9   : > { %v1433_v3 = vsub.f32 %v1425_v62, %v1432_v2 }
 0xabb   : > { %v1434_v4 = vmul.f32 %v1433_v3, %v1433_v3 }
 0xabd   : > { %v1435_v5 = vsel %vm443_vm1, %v1434_v4, 0.0 }
 0xabe   : > { %1436 = vadd.xlane.f32.xlu0 %v1435_v5 }
 0xb4b   : > { %v1437_v6 = vpop.xlane.xlu0 %1436 }
 0xb4c   : > { %v1438_v8 = vmul.f32 0.03125, %v1437_v6 }
 0xb4e   : > { %v1439_v9 = vadd.f32 1e-05, %v1438_v8 }
 0xb50   : > { %1719 = vrsqrt.f32 %v1439_v9 }
 0xb5a   : > { %v1720_v10 = vpop.eup %1719 }
 0xb5b   : > { %v1441_v11 = vmul.f32 %v1720_v10, %v1433_v3 }
 0xb5d   : > { %v1448_v14 = vmul.f32 %v1568_v7, %v1441_v11 }
 0xb5f   : > { %v1455_v15 = vadd.f32 %v1569_v13, %v1448_v14 }
 0xb61   : > { %1456 = vst.msk [vmem:[%s415_s30] sm:$0xff] %vm443_vm1, %v1455_v15 }
 0xb62 PF: > { %s21_s17 = sadd.s32 1, %s1727_s17  }
 0xb63   : > { %p18_p4 = scmp.ge.s32.totalorder %s21_s17, 4  }
 0xb65   :  { %20 = sbr.rel (!%p18_p4) target bundleno = 1 (0x1), region = 100 }

</bundles_post_ra>
